<compile_context>
chip_gen: v7x
topology: tpu7x:2x2x1
jax: 0.10.0
libtpu: 0.0.40
codegen_flags: <defaults>
</compile_context>

<pallas_src>
import math
import functools

import jax
import jax.numpy as jnp
from jax.experimental import pallas as pl
from jax.experimental.pallas import tpu as pltpu


# ------------------------- tiling helpers -------------------------

_TM, _TN, _TK = 256, 256, 512   # MXU-friendly tile targets (safe on v5e/v6e/v7x VMEM)


def _tile(dim, target, align):
    """Largest `align`-multiple divisor of `dim` that is <= target (or the full dim)."""
    if dim <= target:
        return dim
    t = (target // align) * align
    while t >= align:
        if dim % t == 0:
            return t
        t -= align
    # TODO(synk): pad non-divisible dims (e.g. odd vocab sizes) instead of taking the full dim.
    return dim


# ------------------------- Pallas kernels -------------------------

def _linear_kernel(x_ref, w_ref, b_ref, o_ref, acc_ref, *, activation):
    """Tiled  y = act(x @ W + b)  with f32 VMEM accumulator over the K grid axis."""
    @pl.when(pl.program_id(2) == 0)
    def _():
        acc_ref[...] = jnp.zeros_like(acc_ref)

    acc_ref[...] += jnp.dot(x_ref[...].astype(jnp.bfloat16), w_ref[...],
                            preferred_element_type=jnp.float32)

    @pl.when(pl.program_id(2) == pl.num_programs(2) - 1)
    def _():
        y = acc_ref[...] + b_ref[...]
        if activation == "relu":
            y = jnp.maximum(y, 0.0)
        o_ref[...] = y


def pallas_linear(x, w, b, activation=None):
    M, K = x.shape
    _, N = w.shape
    tm, tn, tk = _tile(M, _TM, 8), _tile(N, _TN, 128), _tile(K, _TK, 128)
    return pl.pallas_call(
        functools.partial(_linear_kernel, activation=activation),
        out_shape=jax.ShapeDtypeStruct((M, N), jnp.float32),
        grid_spec=pltpu.PrefetchScalarGridSpec(
            num_scalar_prefetch=0,
            grid=(M // tm, N // tn, K // tk),
            in_specs=[pl.BlockSpec((tm, tk), lambda i, j, k: (i, k)),
                      pl.BlockSpec((tk, tn), lambda i, j, k: (k, j)),
                      pl.BlockSpec((1, tn), lambda i, j, k: (0, j))],
            out_specs=pl.BlockSpec((tm, tn), lambda i, j, k: (i, j)),
            scratch_shapes=[pltpu.VMEM((tm, tn), jnp.float32)]),
        compiler_params=pltpu.CompilerParams(
            dimension_semantics=("parallel", "parallel", "arbitrary")),
    )(x, w, b.reshape(1, N))


def _encoder_kernel(x_ref, w_ref, b_ref, pe_ref, o_ref, acc_ref, *, scale):
    """Encoder linear with fused  *sqrt(ninp) + positional-encoding  epilogue."""
    @pl.when(pl.program_id(1) == 0)
    def _():
        acc_ref[...] = jnp.zeros_like(acc_ref)

    acc_ref[...] += jnp.dot(x_ref[...].astype(jnp.bfloat16), w_ref[...],
                            preferred_element_type=jnp.float32)

    @pl.when(pl.program_id(1) == pl.num_programs(1) - 1)
    def _():
        o_ref[...] = (acc_ref[...] + b_ref[...]) * scale + pe_ref[...]


def pallas_encoder_linear(x, w, b, pe, S, scale):
    M, K = x.shape          # M = B*S
    _, N = w.shape
    tm = _tile(S, _TM, 8)   # row tiles never straddle a sequence boundary
    tk = _tile(K, _TK, 128)
    n_seq_tiles = S // tm
    if n_seq_tiles == 1:
        pe_map = lambda i, k: (0, 0)
    else:
        pe_map = lambda i, k: (i % n_seq_tiles, 0)
    return pl.pallas_call(
        functools.partial(_encoder_kernel, scale=scale),
        out_shape=jax.ShapeDtypeStruct((M, N), jnp.float32),
        grid_spec=pltpu.PrefetchScalarGridSpec(
            num_scalar_prefetch=0,
            grid=(M // tm, K // tk),
            in_specs=[pl.BlockSpec((tm, tk), lambda i, k: (i, k)),
                      pl.BlockSpec((tk, N), lambda i, k: (k, 0)),
                      pl.BlockSpec((1, N), lambda i, k: (0, 0)),
                      pl.BlockSpec((tm, N), pe_map)],
            out_specs=pl.BlockSpec((tm, N), lambda i, k: (i, 0)),
            scratch_shapes=[pltpu.VMEM((tm, N), jnp.float32)]),
        compiler_params=pltpu.CompilerParams(
            dimension_semantics=("parallel", "arbitrary")),
    )(x, w, b.reshape(1, N), pe)


def _linear_res_ln_kernel(x_ref, w_ref, b_ref, r_ref, g_ref, bb_ref, o_ref, acc_ref, *, eps):
    """Tiled  y = LayerNorm(residual + x @ W + b)  — LN fused into the matmul epilogue."""
    @pl.when(pl.program_id(1) == 0)
    def _():
        acc_ref[...] = jnp.zeros_like(acc_ref)

    acc_ref[...] += jnp.dot(x_ref[...].astype(jnp.bfloat16), w_ref[...],
                            preferred_element_type=jnp.float32)

    @pl.when(pl.program_id(1) == pl.num_programs(1) - 1)
    def _():
        h = acc_ref[...] + b_ref[...] + r_ref[...]
        mean = jnp.mean(h, axis=-1, keepdims=True)
        var = jnp.mean(jnp.square(h - mean), axis=-1, keepdims=True)
        o_ref[...] = (h - mean) * jax.lax.rsqrt(var + eps) * g_ref[...] + bb_ref[...]


def pallas_linear_res_ln(x, w, b, res, gamma, beta, eps=1e-5):
    M, K = x.shape
    _, N = w.shape          # N = model dim; kept un-tiled because LN reduces over it
    tm, tk = _tile(M, _TM, 8), _tile(K, _TK, 128)
    return pl.pallas_call(
        functools.partial(_linear_res_ln_kernel, eps=eps),
        out_shape=jax.ShapeDtypeStruct((M, N), jnp.float32),
        grid_spec=pltpu.PrefetchScalarGridSpec(
            num_scalar_prefetch=0,
            grid=(M // tm, K // tk),
            in_specs=[pl.BlockSpec((tm, tk), lambda i, k: (i, k)),
                      pl.BlockSpec((tk, N), lambda i, k: (k, 0)),
                      pl.BlockSpec((1, N), lambda i, k: (0, 0)),
                      pl.BlockSpec((tm, N), lambda i, k: (i, 0)),
                      pl.BlockSpec((1, N), lambda i, k: (0, 0)),
                      pl.BlockSpec((1, N), lambda i, k: (0, 0))],
            out_specs=pl.BlockSpec((tm, N), lambda i, k: (i, 0)),
            scratch_shapes=[pltpu.VMEM((tm, N), jnp.float32)]),
        compiler_params=pltpu.CompilerParams(
            dimension_semantics=("parallel", "arbitrary")),
    )(x, w, b.reshape(1, N), res, gamma.reshape(1, N), beta.reshape(1, N))


def _attention_kernel(qkv_ref, o_ref, *, nhead, head_dim, scale):
    """All heads of one batch per grid step, reading the packed [S, 3D] QKV tile."""
    D = nhead * head_dim
    qkv = qkv_ref[0]                                        # [S, 3D]
    S = qkv.shape[0]
    row = jax.lax.broadcasted_iota(jnp.int32, (S, S), 0)
    col = jax.lax.broadcasted_iota(jnp.int32, (S, S), 1)
    causal = row >= col                                     # in-kernel causal mask
    neg_inf = jnp.float32(-jnp.inf)

    outs = []
    for h in range(nhead):
        q = (qkv[:, h * head_dim:(h + 1) * head_dim] * scale).astype(jnp.bfloat16)
        k = qkv[:, D + h * head_dim:D + (h + 1) * head_dim].astype(jnp.bfloat16)
        v = qkv[:, 2 * D + h * head_dim:2 * D + (h + 1) * head_dim].astype(jnp.bfloat16)
        s = jax.lax.dot_general(q, k, (((1,), (1,)), ((), ())),
                                preferred_element_type=jnp.float32)      # [S, S]
        s = jnp.where(causal, s, neg_inf)
        m = jnp.max(s, axis=-1, keepdims=True)
        p = jnp.exp(s - m)
        p = p * pl.reciprocal(jnp.sum(p, axis=-1, keepdims=True), approx=True)
        outs.append(jnp.dot(p.astype(jnp.bfloat16), v,
                            preferred_element_type=jnp.float32))         # [S, Dh]
    # single lane-dense store in [S, H*Dh] layout (heads already merged for out_proj)
    o_ref[0] = jnp.concatenate(outs, axis=-1)


def pallas_attention(qkv, nhead, head_dim, scale):
    B, S, threeD = qkv.shape
    D = nhead * head_dim
    assert threeD == 3 * D
    # TODO(synk): for long sequences, tile over query rows (flash-style) to bound the
    #             S x S score tile in VMEM; full-S tiles are fine at BERT-base lengths.
    return pl.pallas_call(
        functools.partial(_attention_kernel, nhead=nhead, head_dim=head_dim, scale=scale),
        out_shape=jax.ShapeDtypeStruct((B, S, D), jnp.float32),
        grid_spec=pltpu.PrefetchScalarGridSpec(
            num_scalar_prefetch=0,
            grid=(B,),
            in_specs=[pl.BlockSpec((1, S, threeD), lambda b: (b, 0, 0))],
            out_specs=pl.BlockSpec((1, S, D), lambda b: (b, 0, 0))),
        compiler_params=pltpu.CompilerParams(dimension_semantics=("parallel",)),
    )(qkv)


# ------------------------- model forward -------------------------

def transformer_layer(x, layer, B, S, D, H):
    Dh = D // H
    qkv = pallas_linear(x, layer["in_proj_w"], layer["in_proj_b"])          # [B*S, 3D]
    attn = pallas_attention(qkv.reshape(B, S, 3 * D), H, Dh, 1.0 / math.sqrt(Dh))
    attn = attn.reshape(B * S, D)                                           # heads merged in-kernel
    x = pallas_linear_res_ln(attn, layer["out_w"], layer["out_b"], x,
                             layer["ln1_g"], layer["ln1_b"])                # post-norm
    ff = pallas_linear(x, layer["lin1_w"], layer["lin1_b"], activation="relu")
    x = pallas_linear_res_ln(ff, layer["lin2_w"], layer["lin2_b"], x,
                             layer["ln2_g"], layer["ln2_b"])
    return x


def bert_forward(params, src, nhead):
    B, S, ntoken = src.shape
    ninp = params["enc_w"].shape[1]

    # encoder Linear(ntoken -> ninp), *sqrt(ninp) and +PE fused into one kernel.
    x = pallas_encoder_linear(src.reshape(B * S, ntoken), params["enc_w"],
                              params["enc_b"], params["pe"][:S], S, math.sqrt(ninp))

    # src_mask: the PyTorch code builds a (len(src), len(src)) causal mask; with
    # batch_first inputs this is only shape-consistent when batch == seq (as here).
    # The causal mask is generated inside the attention kernel.
    for layer in params["layers"]:
        x = transformer_layer(x, layer, B, S, ninp, nhead)

    out = pallas_linear(x, params["dec_w"], params["dec_b"])                # decoder
    return out.reshape(B, S, ntoken)


# ------------------------- parameters -------------------------

def init_params(key, ntoken, ninp, nhead, nhid, nlayers, max_len):
    keys = jax.random.split(key, 4 + nlayers)
    wdt = jnp.bfloat16   # matmul weights stored in bf16 (f32 accumulation in-kernel)

    r_enc = math.sqrt(3.0 / ninp)
    enc_w = jax.random.uniform(keys[0], (ntoken, ninp), jnp.float32, -r_enc, r_enc).astype(wdt)
    enc_b = jnp.zeros((ninp,), jnp.float32)
    r_dec = math.sqrt(6.0 / (ninp + ntoken))
    dec_w = jax.random.uniform(keys[1], (ninp, ntoken), jnp.float32, -r_dec, r_dec).astype(wdt)
    dec_b = jnp.zeros((ntoken,), jnp.float32)

    # sinusoidal positional encoding (same formula as PositionalEncoding)
    pos = jnp.arange(max_len, dtype=jnp.float32)[:, None]
    div = jnp.exp(jnp.arange(0, ninp, 2, dtype=jnp.float32) * (-math.log(10000.0) / ninp))
    pe = jnp.zeros((max_len, ninp), jnp.float32)
    pe = pe.at[:, 0::2].set(jnp.sin(pos * div))
    pe = pe.at[:, 1::2].set(jnp.cos(pos * div))

    layers = []
    r = math.sqrt(3.0 / ninp)
    for l in range(nlayers):
        lk = jax.random.split(keys[4 + l], 4)
        layers.append(dict(
            in_proj_w=jax.random.uniform(lk[0], (ninp, 3 * ninp), jnp.float32, -r, r).astype(wdt),
            in_proj_b=jnp.zeros((3 * ninp,), jnp.float32),
            out_w=jax.random.uniform(lk[1], (ninp, ninp), jnp.float32, -r, r).astype(wdt),
            out_b=jnp.zeros((ninp,), jnp.float32),
            lin1_w=jax.random.uniform(lk[2], (ninp, nhid), jnp.float32, -r, r).astype(wdt),
            lin1_b=jnp.zeros((nhid,), jnp.float32),
            lin2_w=jax.random.uniform(lk[3], (nhid, ninp), jnp.float32, -r, r).astype(wdt),
            lin2_b=jnp.zeros((ninp,), jnp.float32),
            ln1_g=jnp.ones((ninp,), jnp.float32), ln1_b=jnp.zeros((ninp,), jnp.float32),
            ln2_g=jnp.ones((ninp,), jnp.float32), ln2_b=jnp.zeros((ninp,), jnp.float32),
        ))
    return dict(enc_w=enc_w, enc_b=enc_b, dec_w=dec_w, dec_b=dec_b, pe=pe, layers=layers)


# ------------------------- pure-JAX reference (same bf16 matmul numerics) -------------------------

def _ln(h, g, b, eps=1e-5):
    mean = jnp.mean(h, axis=-1, keepdims=True)
    var = jnp.mean(jnp.square(h - mean), axis=-1, keepdims=True)
    return (h - mean) * jax.lax.rsqrt(var + eps) * g + b


def _ref_linear(x, w, b):
    return jnp.dot(x.astype(jnp.bfloat16), w, preferred_element_type=jnp.float32) + b


def reference_forward(params, src, nhead):
    B, S, ntoken = src.shape
    ninp = params["enc_w"].shape[1]
    Dh = ninp // nhead
    x = _ref_linear(src.reshape(B * S, ntoken), params["enc_w"], params["enc_b"])
    x = x * math.sqrt(ninp) + jnp.tile(params["pe"][:S], (B, 1))
    causal = jnp.tril(jnp.ones((S, S), dtype=bool))
    for layer in params["layers"]:
        qkv = _ref_linear(x, layer["in_proj_w"], layer["in_proj_b"])
        q, k, v = jnp.split(qkv, 3, axis=-1)
        hsplit = lambda t: t.reshape(B, S, nhead, Dh).transpose(0, 2, 1, 3)
        q, k, v = hsplit(q) * (1.0 / math.sqrt(Dh)), hsplit(k), hsplit(v)
        s = jnp.einsum("bhqd,bhkd->bhqk", q.astype(jnp.bfloat16), k.astype(jnp.bfloat16),
                       preferred_element_type=jnp.float32)
        s = jnp.where(causal, s, -jnp.inf)
        p = jax.nn.softmax(s, axis=-1)
        a = jnp.einsum("bhqk,bhkd->bhqd", p.astype(jnp.bfloat16), v.astype(jnp.bfloat16),
                       preferred_element_type=jnp.float32)
        a = a.transpose(0, 2, 1, 3).reshape(B * S, ninp)
        x = _ln(x + _ref_linear(a, layer["out_w"], layer["out_b"]),
                layer["ln1_g"], layer["ln1_b"])
        ff = jnp.maximum(_ref_linear(x, layer["lin1_w"], layer["lin1_b"]), 0.0)
        x = _ln(x + _ref_linear(ff, layer["lin2_w"], layer["lin2_b"]),
                layer["ln2_g"], layer["ln2_b"])
    out = _ref_linear(x, params["dec_w"], params["dec_b"])
    return out.reshape(B, S, ntoken)


# ------------------------- main -------------------------

if __name__ == "__main__":
    ntoken, ninp, nhead, nhid, nlayers = 16, 32, 4, 64, 2
    B = S = 8  # torch code builds the mask from len(src) (=batch), so batch must equal seq

    key = jax.random.PRNGKey(0)
    pkey, xkey = jax.random.split(key)
    params = init_params(pkey, ntoken, ninp, nhead, nhid, nlayers, max_len=S)
    src = jax.random.normal(xkey, (B, S, ntoken), dtype=jnp.float32)

    fwd = jax.jit(functools.partial(bert_forward, nhead=nhead))
    out = jax.block_until_ready(fwd(params, src))

    ref = reference_forward(params, src, nhead)
    assert out.shape == (B, S, ntoken)
    assert bool(jnp.allclose(out, ref, atol=2e-2, rtol=2e-2))

    print("KERNEL_OK")
</pallas_src>

<mosaic_0001>
module attributes {stable_mosaic.version = 11 : i64} {
  func.func @_attention_kernel(%arg0: i32, %arg1: memref<1x8x96xf32, #tpu.memory_space<vmem>>, %arg2: memref<1x8x32xf32, #tpu.memory_space<vmem>>) attributes {dimension_semantics = [#tpu.dimension_semantics<parallel>], iteration_bounds = array<i64: 8>, scalar_prefetch = 0 : i64, scratch_operands = 0 : i64, tpu.core_type = #tpu.core_type<tc>, window_params = [{transform_indices = @transform_0, window_bounds = array<i64: 1, 8, 96>}, {transform_indices = @transform_1, window_bounds = array<i64: 1, 8, 32>}]} {
    %c0 = arith.constant 0 : index
    %c0_0 = arith.constant 0 : index
    %c0_1 = arith.constant 0 : index
    %0 = vector.load %arg1[%c0, %c0_0, %c0_1] : memref<1x8x96xf32, #tpu.memory_space<vmem>>, vector<1x8x96xf32>
    %1 = vector.shape_cast %0 : vector<1x8x96xf32> to vector<8x96xf32>
    %2 = tpu.iota {dimensions = array<i32: 0>} : vector<8x8xi32>
    %3 = tpu.iota {dimensions = array<i32: 1>} : vector<8x8xi32>
    %4 = arith.cmpi sge, %2, %3 : vector<8x8xi32>
    %5 = vector.extract_strided_slice %1 {offsets = [0, 0], sizes = [8, 8], strides = [1, 1]} : vector<8x96xf32> to vector<8x8xf32>
    %cst = arith.constant 0.353553385 : f32
    %6 = vector.broadcast %cst : f32 to vector<8x8xf32>
    %7 = arith.mulf %5, %6 : vector<8x8xf32>
    %8 = arith.truncf %7 : vector<8x8xf32> to vector<8x8xbf16>
    %9 = vector.extract_strided_slice %1 {offsets = [0, 32], sizes = [8, 8], strides = [1, 1]} : vector<8x96xf32> to vector<8x8xf32>
    %10 = arith.truncf %9 : vector<8x8xf32> to vector<8x8xbf16>
    %11 = vector.extract_strided_slice %1 {offsets = [0, 64], sizes = [8, 8], strides = [1, 1]} : vector<8x96xf32> to vector<8x8xf32>
    %12 = arith.truncf %11 : vector<8x8xf32> to vector<8x8xbf16>
    %cst_2 = arith.constant dense<0.000000e+00> : vector<8x8xf32>
    %13 = tpu.matmul %8, %10, %cst_2 {dimension_numbers = #tpu.dot_dimension_numbers<[1], [1], [0], [0], [0, 0, 1, 0], [], []>} : vector<8x8xbf16>, vector<8x8xbf16>, vector<8x8xf32> -> vector<8x8xf32>
    %cst_3 = arith.constant 0xFF800000 : f32
    %14 = vector.broadcast %cst_3 : f32 to vector<8x8xf32>
    %15 = arith.select %4, %13, %14 : vector<8x8xi1>, vector<8x8xf32>
    %cst_4 = arith.constant dense<0xFF800000> : vector<8xf32>
    %16 = vector.multi_reduction <maximumf>, %15, %cst_4 [1] : vector<8x8xf32> to vector<8xf32>
    %17 = vector.shape_cast %16 : vector<8xf32> to vector<8x1xf32>
    %18 = vector.broadcast %17 : vector<8x1xf32> to vector<8x8xf32>
    %19 = arith.subf %15, %18 : vector<8x8xf32>
    %20 = math.exp %19 : vector<8x8xf32>
    %cst_5 = arith.constant dense<0.000000e+00> : vector<8xf32>
    %21 = vector.multi_reduction <add>, %20, %cst_5 [1] : vector<8x8xf32> to vector<8xf32>
    %22 = vector.shape_cast %21 : vector<8xf32> to vector<8x1xf32>
    %23 = tpu.reciprocal %22 {approx = true} : vector<8x1xf32> -> vector<8x1xf32>
    %24 = vector.broadcast %23 : vector<8x1xf32> to vector<8x8xf32>
    %25 = arith.mulf %20, %24 : vector<8x8xf32>
    %26 = arith.truncf %25 : vector<8x8xf32> to vector<8x8xbf16>
    %cst_6 = arith.constant dense<0.000000e+00> : vector<8x8xf32>
    %27 = tpu.matmul %26, %12, %cst_6 {dimension_numbers = #tpu.dot_dimension_numbers<[1], [0], [0], [1], [0, 0, 1, 1], [], []>} : vector<8x8xbf16>, vector<8x8xbf16>, vector<8x8xf32> -> vector<8x8xf32>
    %28 = vector.extract_strided_slice %1 {offsets = [0, 8], sizes = [8, 8], strides = [1, 1]} : vector<8x96xf32> to vector<8x8xf32>
    %cst_7 = arith.constant 0.353553385 : f32
    %29 = vector.broadcast %cst_7 : f32 to vector<8x8xf32>
    %30 = arith.mulf %28, %29 : vector<8x8xf32>
    %31 = arith.truncf %30 : vector<8x8xf32> to vector<8x8xbf16>
    %32 = vector.extract_strided_slice %1 {offsets = [0, 40], sizes = [8, 8], strides = [1, 1]} : vector<8x96xf32> to vector<8x8xf32>
    %33 = arith.truncf %32 : vector<8x8xf32> to vector<8x8xbf16>
    %34 = vector.extract_strided_slice %1 {offsets = [0, 72], sizes = [8, 8], strides = [1, 1]} : vector<8x96xf32> to vector<8x8xf32>
    %35 = arith.truncf %34 : vector<8x8xf32> to vector<8x8xbf16>
    %cst_8 = arith.constant dense<0.000000e+00> : vector<8x8xf32>
    %36 = tpu.matmul %31, %33, %cst_8 {dimension_numbers = #tpu.dot_dimension_numbers<[1], [1], [0], [0], [0, 0, 1, 0], [], []>} : vector<8x8xbf16>, vector<8x8xbf16>, vector<8x8xf32> -> vector<8x8xf32>
    %cst_9 = arith.constant 0xFF800000 : f32
    %37 = vector.broadcast %cst_9 : f32 to vector<8x8xf32>
    %38 = arith.select %4, %36, %37 : vector<8x8xi1>, vector<8x8xf32>
    %cst_10 = arith.constant dense<0xFF800000> : vector<8xf32>
    %39 = vector.multi_reduction <maximumf>, %38, %cst_10 [1] : vector<8x8xf32> to vector<8xf32>
    %40 = vector.shape_cast %39 : vector<8xf32> to vector<8x1xf32>
    %41 = vector.broadcast %40 : vector<8x1xf32> to vector<8x8xf32>
    %42 = arith.subf %38, %41 : vector<8x8xf32>
    %43 = math.exp %42 : vector<8x8xf32>
    %cst_11 = arith.constant dense<0.000000e+00> : vector<8xf32>
    %44 = vector.multi_reduction <add>, %43, %cst_11 [1] : vector<8x8xf32> to vector<8xf32>
    %45 = vector.shape_cast %44 : vector<8xf32> to vector<8x1xf32>
    %46 = tpu.reciprocal %45 {approx = true} : vector<8x1xf32> -> vector<8x1xf32>
    %47 = vector.broadcast %46 : vector<8x1xf32> to vector<8x8xf32>
    %48 = arith.mulf %43, %47 : vector<8x8xf32>
    %49 = arith.truncf %48 : vector<8x8xf32> to vector<8x8xbf16>
    %cst_12 = arith.constant dense<0.000000e+00> : vector<8x8xf32>
    %50 = tpu.matmul %49, %35, %cst_12 {dimension_numbers = #tpu.dot_dimension_numbers<[1], [0], [0], [1], [0, 0, 1, 1], [], []>} : vector<8x8xbf16>, vector<8x8xbf16>, vector<8x8xf32> -> vector<8x8xf32>
    %51 = vector.extract_strided_slice %1 {offsets = [0, 16], sizes = [8, 8], strides = [1, 1]} : vector<8x96xf32> to vector<8x8xf32>
    %cst_13 = arith.constant 0.353553385 : f32
    %52 = vector.broadcast %cst_13 : f32 to vector<8x8xf32>
    %53 = arith.mulf %51, %52 : vector<8x8xf32>
    %54 = arith.truncf %53 : vector<8x8xf32> to vector<8x8xbf16>
    %55 = vector.extract_strided_slice %1 {offsets = [0, 48], sizes = [8, 8], strides = [1, 1]} : vector<8x96xf32> to vector<8x8xf32>
    %56 = arith.truncf %55 : vector<8x8xf32> to vector<8x8xbf16>
    %57 = vector.extract_strided_slice %1 {offsets = [0, 80], sizes = [8, 8], strides = [1, 1]} : vector<8x96xf32> to vector<8x8xf32>
    %58 = arith.truncf %57 : vector<8x8xf32> to vector<8x8xbf16>
    %cst_14 = arith.constant dense<0.000000e+00> : vector<8x8xf32>
    %59 = tpu.matmul %54, %56, %cst_14 {dimension_numbers = #tpu.dot_dimension_numbers<[1], [1], [0], [0], [0, 0, 1, 0], [], []>} : vector<8x8xbf16>, vector<8x8xbf16>, vector<8x8xf32> -> vector<8x8xf32>
    %cst_15 = arith.constant 0xFF800000 : f32
    %60 = vector.broadcast %cst_15 : f32 to vector<8x8xf32>
    %61 = arith.select %4, %59, %60 : vector<8x8xi1>, vector<8x8xf32>
    %cst_16 = arith.constant dense<0xFF800000> : vector<8xf32>
    %62 = vector.multi_reduction <maximumf>, %61, %cst_16 [1] : vector<8x8xf32> to vector<8xf32>
    %63 = vector.shape_cast %62 : vector<8xf32> to vector<8x1xf32>
    %64 = vector.broadcast %63 : vector<8x1xf32> to vector<8x8xf32>
    %65 = arith.subf %61, %64 : vector<8x8xf32>
    %66 = math.exp %65 : vector<8x8xf32>
    %cst_17 = arith.constant dense<0.000000e+00> : vector<8xf32>
    %67 = vector.multi_reduction <add>, %66, %cst_17 [1] : vector<8x8xf32> to vector<8xf32>
    %68 = vector.shape_cast %67 : vector<8xf32> to vector<8x1xf32>
    %69 = tpu.reciprocal %68 {approx = true} : vector<8x1xf32> -> vector<8x1xf32>
    %70 = vector.broadcast %69 : vector<8x1xf32> to vector<8x8xf32>
    %71 = arith.mulf %66, %70 : vector<8x8xf32>
    %72 = arith.truncf %71 : vector<8x8xf32> to vector<8x8xbf16>
    %cst_18 = arith.constant dense<0.000000e+00> : vector<8x8xf32>
    %73 = tpu.matmul %72, %58, %cst_18 {dimension_numbers = #tpu.dot_dimension_numbers<[1], [0], [0], [1], [0, 0, 1, 1], [], []>} : vector<8x8xbf16>, vector<8x8xbf16>, vector<8x8xf32> -> vector<8x8xf32>
    %74 = vector.extract_strided_slice %1 {offsets = [0, 24], sizes = [8, 8], strides = [1, 1]} : vector<8x96xf32> to vector<8x8xf32>
    %cst_19 = arith.constant 0.353553385 : f32
    %75 = vector.broadcast %cst_19 : f32 to vector<8x8xf32>
    %76 = arith.mulf %74, %75 : vector<8x8xf32>
    %77 = arith.truncf %76 : vector<8x8xf32> to vector<8x8xbf16>
    %78 = vector.extract_strided_slice %1 {offsets = [0, 56], sizes = [8, 8], strides = [1, 1]} : vector<8x96xf32> to vector<8x8xf32>
    %79 = arith.truncf %78 : vector<8x8xf32> to vector<8x8xbf16>
    %80 = vector.extract_strided_slice %1 {offsets = [0, 88], sizes = [8, 8], strides = [1, 1]} : vector<8x96xf32> to vector<8x8xf32>
    %81 = arith.truncf %80 : vector<8x8xf32> to vector<8x8xbf16>
    %cst_20 = arith.constant dense<0.000000e+00> : vector<8x8xf32>
    %82 = tpu.matmul %77, %79, %cst_20 {dimension_numbers = #tpu.dot_dimension_numbers<[1], [1], [0], [0], [0, 0, 1, 0], [], []>} : vector<8x8xbf16>, vector<8x8xbf16>, vector<8x8xf32> -> vector<8x8xf32>
    %cst_21 = arith.constant 0xFF800000 : f32
    %83 = vector.broadcast %cst_21 : f32 to vector<8x8xf32>
    %84 = arith.select %4, %82, %83 : vector<8x8xi1>, vector<8x8xf32>
    %cst_22 = arith.constant dense<0xFF800000> : vector<8xf32>
    %85 = vector.multi_reduction <maximumf>, %84, %cst_22 [1] : vector<8x8xf32> to vector<8xf32>
    %86 = vector.shape_cast %85 : vector<8xf32> to vector<8x1xf32>
    %87 = vector.broadcast %86 : vector<8x1xf32> to vector<8x8xf32>
    %88 = arith.subf %84, %87 : vector<8x8xf32>
    %89 = math.exp %88 : vector<8x8xf32>
    %cst_23 = arith.constant dense<0.000000e+00> : vector<8xf32>
    %90 = vector.multi_reduction <add>, %89, %cst_23 [1] : vector<8x8xf32> to vector<8xf32>
    %91 = vector.shape_cast %90 : vector<8xf32> to vector<8x1xf32>
    %92 = tpu.reciprocal %91 {approx = true} : vector<8x1xf32> -> vector<8x1xf32>
    %93 = vector.broadcast %92 : vector<8x1xf32> to vector<8x8xf32>
    %94 = arith.mulf %89, %93 : vector<8x8xf32>
    %95 = arith.truncf %94 : vector<8x8xf32> to vector<8x8xbf16>
    %cst_24 = arith.constant dense<0.000000e+00> : vector<8x8xf32>
    %96 = tpu.matmul %95, %81, %cst_24 {dimension_numbers = #tpu.dot_dimension_numbers<[1], [0], [0], [1], [0, 0, 1, 1], [], []>} : vector<8x8xbf16>, vector<8x8xbf16>, vector<8x8xf32> -> vector<8x8xf32>
    %97 = tpu.concatenate %27, %50, %73, %96 in 1 : vector<8x8xf32>, vector<8x8xf32>, vector<8x8xf32>, vector<8x8xf32> -> vector<8x32xf32>
    %c0_25 = arith.constant 0 : index
    %c0_26 = arith.constant 0 : index
    %c0_27 = arith.constant 0 : index
    %98 = vector.load %arg2[%c0_25, %c0_26, %c0_27] : memref<1x8x32xf32, #tpu.memory_space<vmem>>, vector<1x8x32xf32>
    %99 = vector.shape_cast %98 : vector<1x8x32xf32> to vector<8x32xf32>
    %100 = vector.shape_cast %97 : vector<8x32xf32> to vector<1x8x32xf32>
    tpu.vector_store %arg2[%c0_25, %c0_26, %c0_27], %100 {strides = array<i32>} : memref<1x8x32xf32, #tpu.memory_space<vmem>>, vector<1x8x32xf32>,
    return
  }
  func.func @transform_0(%arg0: i32) -> (i32, i32, i32) {
    %c0_i32 = arith.constant 0 : i32
    %c0_i32_0 = arith.constant 0 : i32
    %c0_i32_1 = arith.constant 0 : i32
    return %arg0, %c0_i32, %c0_i32_0 : i32, i32, i32
  }
  func.func @transform_1(%arg0: i32) -> (i32, i32, i32) {
    %c0_i32 = arith.constant 0 : i32
    %c0_i32_0 = arith.constant 0 : i32
    %c0_i32_1 = arith.constant 0 : i32
    return %arg0, %c0_i32, %c0_i32_0 : i32, i32, i32
  }
}

module attributes {stable_mosaic.version = 11 : i64} {
  func.func @_linear_res_ln_kernel(%arg0: i32, %arg1: i32, %arg2: memref<64x32xf32, #tpu.memory_space<vmem>>, %arg3: memref<32x32xbf16, #tpu.memory_space<vmem>>, %arg4: memref<1x32xf32, #tpu.memory_space<vmem>>, %arg5: memref<64x32xf32, #tpu.memory_space<vmem>>, %arg6: memref<1x32xf32, #tpu.memory_space<vmem>>, %arg7: memref<1x32xf32, #tpu.memory_space<vmem>>, %arg8: memref<64x32xf32, #tpu.memory_space<vmem>>, %arg9: memref<64x32xf32, #tpu.memory_space<vmem>>) attributes {dimension_semantics = [#tpu.dimension_semantics<parallel>, #tpu.dimension_semantics<arbitrary>], iteration_bounds = array<i64: 1, 1>, scalar_prefetch = 0 : i64, scratch_operands = 1 : i64, tpu.core_type = #tpu.core_type<tc>, window_params = [{transform_indices = @transform_0, window_bounds = array<i64: 64, 32>}, {transform_indices = @transform_1, window_bounds = array<i64: 32, 32>}, {pipeline_mode = #tpu.pipeline_mode<synchronous>, transform_indices = @transform_2, window_bounds = array<i64: 1, 32>}, {transform_indices = @transform_3, window_bounds = array<i64: 64, 32>}, {pipeline_mode = #tpu.pipeline_mode<synchronous>, transform_indices = @transform_4, window_bounds = array<i64: 1, 32>}, {pipeline_mode = #tpu.pipeline_mode<synchronous>, transform_indices = @transform_5, window_bounds = array<i64: 1, 32>}, {transform_indices = @transform_6, window_bounds = array<i64: 64, 32>}]} {
    %c0_i32 = arith.constant 0 : i32
    %0 = arith.cmpi eq, %arg1, %c0_i32 : i32
    %1 = arith.extui %0 : i1 to i32
    %c0_i32_0 = arith.constant 0 : i32
    %2 = arith.cmpi ne, %1, %c0_i32_0 : i32
    scf.if %2 {
      %cst_10 = arith.constant 0.000000e+00 : f32
      %13 = vector.broadcast %cst_10 : f32 to vector<64x32xf32>
      %c0_11 = arith.constant 0 : index
      %c0_12 = arith.constant 0 : index
      %14 = vector.load %arg9[%c0_11, %c0_12] : memref<64x32xf32, #tpu.memory_space<vmem>>, vector<64x32xf32>
      tpu.vector_store %arg9[%c0_11, %c0_12], %13 {strides = array<i32>} : memref<64x32xf32, #tpu.memory_space<vmem>>, vector<64x32xf32>,
    } else {
    }
    %c0 = arith.constant 0 : index
    %c0_1 = arith.constant 0 : index
    %3 = vector.load %arg9[%c0, %c0_1] : memref<64x32xf32, #tpu.memory_space<vmem>>, vector<64x32xf32>
    %c0_2 = arith.constant 0 : index
    %c0_3 = arith.constant 0 : index
    %4 = vector.load %arg2[%c0_2, %c0_3] : memref<64x32xf32, #tpu.memory_space<vmem>>, vector<64x32xf32>
    %5 = arith.truncf %4 : vector<64x32xf32> to vector<64x32xbf16>
    %c0_4 = arith.constant 0 : index
    %c0_5 = arith.constant 0 : index
    %6 = vector.load %arg3[%c0_4, %c0_5] : memref<32x32xbf16, #tpu.memory_space<vmem>>, vector<32x32xbf16>
    %cst = arith.constant dense<0.000000e+00> : vector<64x32xf32>
    %7 = tpu.matmul %5, %6, %cst {dimension_numbers = #tpu.dot_dimension_numbers<[1], [0], [0], [1], [0, 0, 1, 1], [], []>} : vector<64x32xbf16>, vector<32x32xbf16>, vector<64x32xf32> -> vector<64x32xf32>
    %8 = arith.addf %3, %7 : vector<64x32xf32>
    %c0_6 = arith.constant 0 : index
    %c0_7 = arith.constant 0 : index
    %9 = vector.load %arg9[%c0_6, %c0_7] : memref<64x32xf32, #tpu.memory_space<vmem>>, vector<64x32xf32>
    tpu.vector_store %arg9[%c0_6, %c0_7], %8 {strides = array<i32>} : memref<64x32xf32, #tpu.memory_space<vmem>>, vector<64x32xf32>,
    %c0_i32_8 = arith.constant 0 : i32
    %10 = arith.cmpi eq, %arg1, %c0_i32_8 : i32
    %11 = arith.extui %10 : i1 to i32
    %c0_i32_9 = arith.constant 0 : i32
    %12 = arith.cmpi ne, %11, %c0_i32_9 : i32
    scf.if %12 {
      %c0_10 = arith.constant 0 : index
      %c0_11 = arith.constant 0 : index
      %13 = vector.load %arg9[%c0_10, %c0_11] : memref<64x32xf32, #tpu.memory_space<vmem>>, vector<64x32xf32>
      %c0_12 = arith.constant 0 : index
      %c0_13 = arith.constant 0 : index
      %14 = vector.load %arg4[%c0_12, %c0_13] : memref<1x32xf32, #tpu.memory_space<vmem>>, vector<1x32xf32>
      %15 = vector.broadcast %14 : vector<1x32xf32> to vector<64x32xf32>
      %16 = arith.addf %13, %15 : vector<64x32xf32>
      %c0_14 = arith.constant 0 : index
      %c0_15 = arith.constant 0 : index
      %17 = vector.load %arg5[%c0_14, %c0_15] : memref<64x32xf32, #tpu.memory_space<vmem>>, vector<64x32xf32>
      %18 = arith.addf %16, %17 : vector<64x32xf32>
      %cst_16 = arith.constant dense<0.000000e+00> : vector<64xf32>
      %19 = vector.multi_reduction <add>, %18, %cst_16 [1] : vector<64x32xf32> to vector<64xf32>
      %20 = vector.shape_cast %19 : vector<64xf32> to vector<64x1xf32>
      %cst_17 = arith.constant 3.200000e+01 : f32
      %21 = vector.broadcast %cst_17 : f32 to vector<64x1xf32>
      %22 = arith.divf %20, %21 : vector<64x1xf32>
      %23 = vector.broadcast %22 : vector<64x1xf32> to vector<64x32xf32>
      %24 = arith.subf %18, %23 : vector<64x32xf32>
      %25 = arith.mulf %24, %24 : vector<64x32xf32>
      %cst_18 = arith.constant dense<0.000000e+00> : vector<64xf32>
      %26 = vector.multi_reduction <add>, %25, %cst_18 [1] : vector<64x32xf32> to vector<64xf32>
      %27 = vector.shape_cast %26 : vector<64xf32> to vector<64x1xf32>
      %cst_19 = arith.constant 3.200000e+01 : f32
      %28 = vector.broadcast %cst_19 : f32 to vector<64x1xf32>
      %29 = arith.divf %27, %28 : vector<64x1xf32>
      %30 = vector.broadcast %22 : vector<64x1xf32> to vector<64x32xf32>
      %31 = arith.subf %18, %30 : vector<64x32xf32>
      %cst_20 = arith.constant 9.99999974E-6 : f32
      %32 = vector.broadcast %cst_20 : f32 to vector<64x1xf32>
      %33 = arith.addf %29, %32 : vector<64x1xf32>
      %34 = math.rsqrt %33 : vector<64x1xf32>
      %35 = vector.broadcast %34 : vector<64x1xf32> to vector<64x32xf32>
      %36 = arith.mulf %31, %35 : vector<64x32xf32>
      %c0_21 = arith.constant 0 : index
      %c0_22 = arith.constant 0 : index
      %37 = vector.load %arg6[%c0_21, %c0_22] : memref<1x32xf32, #tpu.memory_space<vmem>>, vector<1x32xf32>
      %38 = vector.broadcast %37 : vector<1x32xf32> to vector<64x32xf32>
      %39 = arith.mulf %36, %38 : vector<64x32xf32>
      %c0_23 = arith.constant 0 : index
      %c0_24 = arith.constant 0 : index
      %40 = vector.load %arg7[%c0_23, %c0_24] : memref<1x32xf32, #tpu.memory_space<vmem>>, vector<1x32xf32>
      %41 = vector.broadcast %40 : vector<1x32xf32> to vector<64x32xf32>
      %42 = arith.addf %39, %41 : vector<64x32xf32>
      %c0_25 = arith.constant 0 : index
      %c0_26 = arith.constant 0 : index
      %43 = vector.load %arg8[%c0_25, %c0_26] : memref<64x32xf32, #tpu.memory_space<vmem>>, vector<64x32xf32>
      tpu.vector_store %arg8[%c0_25, %c0_26], %42 {strides = array<i32>} : memref<64x32xf32, #tpu.memory_space<vmem>>, vector<64x32xf32>,
    } else {
    }
    return
  }
  func.func @transform_0(%arg0: i32, %arg1: i32) -> (i32, i32) {
    %c0_i32 = arith.constant 0 : i32
    return %arg0, %arg1 : i32, i32
  }
  func.func @transform_1(%arg0: i32, %arg1: i32) -> (i32, i32) {
    %c0_i32 = arith.constant 0 : i32
    %c0_i32_0 = arith.constant 0 : i32
    return %arg1, %c0_i32 : i32, i32
  }
  func.func @transform_2(%arg0: i32, %arg1: i32) -> (i32, i32) {
    %c0_i32 = arith.constant 0 : i32
    %c0_i32_0 = arith.constant 0 : i32
    %c0_i32_1 = arith.constant 0 : i32
    return %c0_i32, %c0_i32_0 : i32, i32
  }
  func.func @transform_3(%arg0: i32, %arg1: i32) -> (i32, i32) {
    %c0_i32 = arith.constant 0 : i32
    %c0_i32_0 = arith.constant 0 : i32
    return %arg0, %c0_i32 : i32, i32
  }
  func.func @transform_4(%arg0: i32, %arg1: i32) -> (i32, i32) {
    %c0_i32 = arith.constant 0 : i32
    %c0_i32_0 = arith.constant 0 : i32
    %c0_i32_1 = arith.constant 0 : i32
    return %c0_i32, %c0_i32_0 : i32, i32
  }
  func.func @transform_5(%arg0: i32, %arg1: i32) -> (i32, i32) {
    %c0_i32 = arith.constant 0 : i32
    %c0_i32_0 = arith.constant 0 : i32
    %c0_i32_1 = arith.constant 0 : i32
    return %c0_i32, %c0_i32_0 : i32, i32
  }
  func.func @transform_6(%arg0: i32, %arg1: i32) -> (i32, i32) {
    %c0_i32 = arith.constant 0 : i32
    %c0_i32_0 = arith.constant 0 : i32
    return %arg0, %c0_i32 : i32, i32
  }
}

module attributes {stable_mosaic.version = 11 : i64} {
  func.func @_linear_kernel(%arg0: i32, %arg1: i32, %arg2: i32, %arg3: memref<64x32xf32, #tpu.memory_space<vmem>>, %arg4: memref<32x96xbf16, #tpu.memory_space<vmem>>, %arg5: memref<1x96xf32, #tpu.memory_space<vmem>>, %arg6: memref<64x96xf32, #tpu.memory_space<vmem>>, %arg7: memref<64x96xf32, #tpu.memory_space<vmem>>) attributes {dimension_semantics = [#tpu.dimension_semantics<parallel>, #tpu.dimension_semantics<parallel>, #tpu.dimension_semantics<arbitrary>], iteration_bounds = array<i64: 1, 1, 1>, scalar_prefetch = 0 : i64, scratch_operands = 1 : i64, tpu.core_type = #tpu.core_type<tc>, window_params = [{transform_indices = @transform_0, window_bounds = array<i64: 64, 32>}, {transform_indices = @transform_1, window_bounds = array<i64: 32, 96>}, {transform_indices = @transform_2, window_bounds = array<i64: 1, 96>}, {transform_indices = @transform_3, window_bounds = array<i64: 64, 96>}]} {
    %c0_i32 = arith.constant 0 : i32
    %0 = arith.cmpi eq, %arg2, %c0_i32 : i32
    %1 = arith.extui %0 : i1 to i32
    %c0_i32_0 = arith.constant 0 : i32
    %2 = arith.cmpi ne, %1, %c0_i32_0 : i32
    scf.if %2 {
      %cst_10 = arith.constant 0.000000e+00 : f32
      %13 = vector.broadcast %cst_10 : f32 to vector<64x96xf32>
      %c0_11 = arith.constant 0 : index
      %c0_12 = arith.constant 0 : index
      %14 = vector.load %arg7[%c0_11, %c0_12] : memref<64x96xf32, #tpu.memory_space<vmem>>, vector<64x96xf32>
      tpu.vector_store %arg7[%c0_11, %c0_12], %13 {strides = array<i32>} : memref<64x96xf32, #tpu.memory_space<vmem>>, vector<64x96xf32>,
    } else {
    }
    %c0 = arith.constant 0 : index
    %c0_1 = arith.constant 0 : index
    %3 = vector.load %arg7[%c0, %c0_1] : memref<64x96xf32, #tpu.memory_space<vmem>>, vector<64x96xf32>
    %c0_2 = arith.constant 0 : index
    %c0_3 = arith.constant 0 : index
    %4 = vector.load %arg3[%c0_2, %c0_3] : memref<64x32xf32, #tpu.memory_space<vmem>>, vector<64x32xf32>
    %5 = arith.truncf %4 : vector<64x32xf32> to vector<64x32xbf16>
    %c0_4 = arith.constant 0 : index
    %c0_5 = arith.constant 0 : index
    %6 = vector.load %arg4[%c0_4, %c0_5] : memref<32x96xbf16, #tpu.memory_space<vmem>>, vector<32x96xbf16>
    %cst = arith.constant dense<0.000000e+00> : vector<64x96xf32>
    %7 = tpu.matmul %5, %6, %cst {dimension_numbers = #tpu.dot_dimension_numbers<[1], [0], [0], [1], [0, 0, 1, 1], [], []>} : vector<64x32xbf16>, vector<32x96xbf16>, vector<64x96xf32> -> vector<64x96xf32>
    %8 = arith.addf %3, %7 : vector<64x96xf32>
    %c0_6 = arith.constant 0 : index
    %c0_7 = arith.constant 0 : index
    %9 = vector.load %arg7[%c0_6, %c0_7] : memref<64x96xf32, #tpu.memory_space<vmem>>, vector<64x96xf32>
    tpu.vector_store %arg7[%c0_6, %c0_7], %8 {strides = array<i32>} : memref<64x96xf32, #tpu.memory_space<vmem>>, vector<64x96xf32>,
    %c0_i32_8 = arith.constant 0 : i32
    %10 = arith.cmpi eq, %arg2, %c0_i32_8 : i32
    %11 = arith.extui %10 : i1 to i32
    %c0_i32_9 = arith.constant 0 : i32
    %12 = arith.cmpi ne, %11, %c0_i32_9 : i32
    scf.if %12 {
      %c0_10 = arith.constant 0 : index
      %c0_11 = arith.constant 0 : index
      %13 = vector.load %arg7[%c0_10, %c0_11] : memref<64x96xf32, #tpu.memory_space<vmem>>, vector<64x96xf32>
      %c0_12 = arith.constant 0 : index
      %c0_13 = arith.constant 0 : index
      %14 = vector.load %arg5[%c0_12, %c0_13] : memref<1x96xf32, #tpu.memory_space<vmem>>, vector<1x96xf32>
      %15 = vector.broadcast %14 : vector<1x96xf32> to vector<64x96xf32>
      %16 = arith.addf %13, %15 : vector<64x96xf32>
      %c0_14 = arith.constant 0 : index
      %c0_15 = arith.constant 0 : index
      %17 = vector.load %arg6[%c0_14, %c0_15] : memref<64x96xf32, #tpu.memory_space<vmem>>, vector<64x96xf32>
      tpu.vector_store %arg6[%c0_14, %c0_15], %16 {strides = array<i32>} : memref<64x96xf32, #tpu.memory_space<vmem>>, vector<64x96xf32>,
    } else {
    }
    return
  }
  func.func @transform_0(%arg0: i32, %arg1: i32, %arg2: i32) -> (i32, i32) {
    %c0_i32 = arith.constant 0 : i32
    return %arg0, %arg2 : i32, i32
  }
  func.func @transform_1(%arg0: i32, %arg1: i32, %arg2: i32) -> (i32, i32) {
    %c0_i32 = arith.constant 0 : i32
    return %arg2, %arg1 : i32, i32
  }
  func.func @transform_2(%arg0: i32, %arg1: i32, %arg2: i32) -> (i32, i32) {
    %c0_i32 = arith.constant 0 : i32
    %c0_i32_0 = arith.constant 0 : i32
    return %c0_i32, %arg1 : i32, i32
  }
  func.func @transform_3(%arg0: i32, %arg1: i32, %arg2: i32) -> (i32, i32) {
    %c0_i32 = arith.constant 0 : i32
    return %arg0, %arg1 : i32, i32
  }
}

module attributes {stable_mosaic.version = 11 : i64} {
  func.func @_encoder_kernel(%arg0: i32, %arg1: i32, %arg2: memref<8x16xf32, #tpu.memory_space<vmem>>, %arg3: memref<16x32xbf16, #tpu.memory_space<vmem>>, %arg4: memref<1x32xf32, #tpu.memory_space<vmem>>, %arg5: memref<8x32xf32, #tpu.memory_space<vmem>>, %arg6: memref<8x32xf32, #tpu.memory_space<vmem>>, %arg7: memref<8x32xf32, #tpu.memory_space<vmem>>) attributes {dimension_semantics = [#tpu.dimension_semantics<parallel>, #tpu.dimension_semantics<arbitrary>], iteration_bounds = array<i64: 8, 1>, scalar_prefetch = 0 : i64, scratch_operands = 1 : i64, tpu.core_type = #tpu.core_type<tc>, window_params = [{transform_indices = @transform_0, window_bounds = array<i64: 8, 16>}, {transform_indices = @transform_1, window_bounds = array<i64: 16, 32>}, {pipeline_mode = #tpu.pipeline_mode<synchronous>, transform_indices = @transform_2, window_bounds = array<i64: 1, 32>}, {pipeline_mode = #tpu.pipeline_mode<synchronous>, transform_indices = @transform_3, window_bounds = array<i64: 8, 32>}, {transform_indices = @transform_4, window_bounds = array<i64: 8, 32>}]} {
    %c0_i32 = arith.constant 0 : i32
    %0 = arith.cmpi eq, %arg1, %c0_i32 : i32
    %1 = arith.extui %0 : i1 to i32
    %c0_i32_0 = arith.constant 0 : i32
    %2 = arith.cmpi ne, %1, %c0_i32_0 : i32
    scf.if %2 {
      %cst_10 = arith.constant 0.000000e+00 : f32
      %13 = vector.broadcast %cst_10 : f32 to vector<8x32xf32>
      %c0_11 = arith.constant 0 : index
      %c0_12 = arith.constant 0 : index
      %14 = vector.load %arg7[%c0_11, %c0_12] : memref<8x32xf32, #tpu.memory_space<vmem>>, vector<8x32xf32>
      tpu.vector_store %arg7[%c0_11, %c0_12], %13 {strides = array<i32>} : memref<8x32xf32, #tpu.memory_space<vmem>>, vector<8x32xf32>,
    } else {
    }
    %c0 = arith.constant 0 : index
    %c0_1 = arith.constant 0 : index
    %3 = vector.load %arg7[%c0, %c0_1] : memref<8x32xf32, #tpu.memory_space<vmem>>, vector<8x32xf32>
    %c0_2 = arith.constant 0 : index
    %c0_3 = arith.constant 0 : index
    %4 = vector.load %arg2[%c0_2, %c0_3] : memref<8x16xf32, #tpu.memory_space<vmem>>, vector<8x16xf32>
    %5 = arith.truncf %4 : vector<8x16xf32> to vector<8x16xbf16>
    %c0_4 = arith.constant 0 : index
    %c0_5 = arith.constant 0 : index
    %6 = vector.load %arg3[%c0_4, %c0_5] : memref<16x32xbf16, #tpu.memory_space<vmem>>, vector<16x32xbf16>
    %cst = arith.constant dense<0.000000e+00> : vector<8x32xf32>
    %7 = tpu.matmul %5, %6, %cst {dimension_numbers = #tpu.dot_dimension_numbers<[1], [0], [0], [1], [0, 0, 1, 1], [], []>} : vector<8x16xbf16>, vector<16x32xbf16>, vector<8x32xf32> -> vector<8x32xf32>
    %8 = arith.addf %3, %7 : vector<8x32xf32>
    %c0_6 = arith.constant 0 : index
    %c0_7 = arith.constant 0 : index
    %9 = vector.load %arg7[%c0_6, %c0_7] : memref<8x32xf32, #tpu.memory_space<vmem>>, vector<8x32xf32>
    tpu.vector_store %arg7[%c0_6, %c0_7], %8 {strides = array<i32>} : memref<8x32xf32, #tpu.memory_space<vmem>>, vector<8x32xf32>,
    %c0_i32_8 = arith.constant 0 : i32
    %10 = arith.cmpi eq, %arg1, %c0_i32_8 : i32
    %11 = arith.extui %10 : i1 to i32
    %c0_i32_9 = arith.constant 0 : i32
    %12 = arith.cmpi ne, %11, %c0_i32_9 : i32
    scf.if %12 {
      %c0_10 = arith.constant 0 : index
      %c0_11 = arith.constant 0 : index
      %13 = vector.load %arg7[%c0_10, %c0_11] : memref<8x32xf32, #tpu.memory_space<vmem>>, vector<8x32xf32>
      %c0_12 = arith.constant 0 : index
      %c0_13 = arith.constant 0 : index
      %14 = vector.load %arg4[%c0_12, %c0_13] : memref<1x32xf32, #tpu.memory_space<vmem>>, vector<1x32xf32>
      %15 = vector.broadcast %14 : vector<1x32xf32> to vector<8x32xf32>
      %16 = arith.addf %13, %15 : vector<8x32xf32>
      %cst_14 = arith.constant 5.65685415 : f32
      %17 = vector.broadcast %cst_14 : f32 to vector<8x32xf32>
      %18 = arith.mulf %16, %17 : vector<8x32xf32>
      %c0_15 = arith.constant 0 : index
      %c0_16 = arith.constant 0 : index
      %19 = vector.load %arg5[%c0_15, %c0_16] : memref<8x32xf32, #tpu.memory_space<vmem>>, vector<8x32xf32>
      %20 = arith.addf %18, %19 : vector<8x32xf32>
      %c0_17 = arith.constant 0 : index
      %c0_18 = arith.constant 0 : index
      %21 = vector.load %arg6[%c0_17, %c0_18] : memref<8x32xf32, #tpu.memory_space<vmem>>, vector<8x32xf32>
      tpu.vector_store %arg6[%c0_17, %c0_18], %20 {strides = array<i32>} : memref<8x32xf32, #tpu.memory_space<vmem>>, vector<8x32xf32>,
    } else {
    }
    return
  }
  func.func @transform_0(%arg0: i32, %arg1: i32) -> (i32, i32) {
    %c0_i32 = arith.constant 0 : i32
    return %arg0, %arg1 : i32, i32
  }
  func.func @transform_1(%arg0: i32, %arg1: i32) -> (i32, i32) {
    %c0_i32 = arith.constant 0 : i32
    %c0_i32_0 = arith.constant 0 : i32
    return %arg1, %c0_i32 : i32, i32
  }
  func.func @transform_2(%arg0: i32, %arg1: i32) -> (i32, i32) {
    %c0_i32 = arith.constant 0 : i32
    %c0_i32_0 = arith.constant 0 : i32
    %c0_i32_1 = arith.constant 0 : i32
    return %c0_i32, %c0_i32_0 : i32, i32
  }
  func.func @transform_3(%arg0: i32, %arg1: i32) -> (i32, i32) {
    %c0_i32 = arith.constant 0 : i32
    %c0_i32_0 = arith.constant 0 : i32
    %c0_i32_1 = arith.constant 0 : i32
    return %c0_i32, %c0_i32_0 : i32, i32
  }
  func.func @transform_4(%arg0: i32, %arg1: i32) -> (i32, i32) {
    %c0_i32 = arith.constant 0 : i32
    %c0_i32_0 = arith.constant 0 : i32
    return %arg0, %c0_i32 : i32, i32
  }
}

module attributes {stable_mosaic.version = 11 : i64} {
  func.func @_linear_res_ln_kernel(%arg0: i32, %arg1: i32, %arg2: memref<64x64xf32, #tpu.memory_space<vmem>>, %arg3: memref<64x32xbf16, #tpu.memory_space<vmem>>, %arg4: memref<1x32xf32, #tpu.memory_space<vmem>>, %arg5: memref<64x32xf32, #tpu.memory_space<vmem>>, %arg6: memref<1x32xf32, #tpu.memory_space<vmem>>, %arg7: memref<1x32xf32, #tpu.memory_space<vmem>>, %arg8: memref<64x32xf32, #tpu.memory_space<vmem>>, %arg9: memref<64x32xf32, #tpu.memory_space<vmem>>) attributes {dimension_semantics = [#tpu.dimension_semantics<parallel>, #tpu.dimension_semantics<arbitrary>], iteration_bounds = array<i64: 1, 1>, scalar_prefetch = 0 : i64, scratch_operands = 1 : i64, tpu.core_type = #tpu.core_type<tc>, window_params = [{transform_indices = @transform_0, window_bounds = array<i64: 64, 64>}, {transform_indices = @transform_1, window_bounds = array<i64: 64, 32>}, {pipeline_mode = #tpu.pipeline_mode<synchronous>, transform_indices = @transform_2, window_bounds = array<i64: 1, 32>}, {transform_indices = @transform_3, window_bounds = array<i64: 64, 32>}, {pipeline_mode = #tpu.pipeline_mode<synchronous>, transform_indices = @transform_4, window_bounds = array<i64: 1, 32>}, {pipeline_mode = #tpu.pipeline_mode<synchronous>, transform_indices = @transform_5, window_bounds = array<i64: 1, 32>}, {transform_indices = @transform_6, window_bounds = array<i64: 64, 32>}]} {
    %c0_i32 = arith.constant 0 : i32
    %0 = arith.cmpi eq, %arg1, %c0_i32 : i32
    %1 = arith.extui %0 : i1 to i32
    %c0_i32_0 = arith.constant 0 : i32
    %2 = arith.cmpi ne, %1, %c0_i32_0 : i32
    scf.if %2 {
      %cst_10 = arith.constant 0.000000e+00 : f32
      %13 = vector.broadcast %cst_10 : f32 to vector<64x32xf32>
      %c0_11 = arith.constant 0 : index
      %c0_12 = arith.constant 0 : index
      %14 = vector.load %arg9[%c0_11, %c0_12] : memref<64x32xf32, #tpu.memory_space<vmem>>, vector<64x32xf32>
      tpu.vector_store %arg9[%c0_11, %c0_12], %13 {strides = array<i32>} : memref<64x32xf32, #tpu.memory_space<vmem>>, vector<64x32xf32>,
    } else {
    }
    %c0 = arith.constant 0 : index
    %c0_1 = arith.constant 0 : index
    %3 = vector.load %arg9[%c0, %c0_1] : memref<64x32xf32, #tpu.memory_space<vmem>>, vector<64x32xf32>
    %c0_2 = arith.constant 0 : index
    %c0_3 = arith.constant 0 : index
    %4 = vector.load %arg2[%c0_2, %c0_3] : memref<64x64xf32, #tpu.memory_space<vmem>>, vector<64x64xf32>
    %5 = arith.truncf %4 : vector<64x64xf32> to vector<64x64xbf16>
    %c0_4 = arith.constant 0 : index
    %c0_5 = arith.constant 0 : index
    %6 = vector.load %arg3[%c0_4, %c0_5] : memref<64x32xbf16, #tpu.memory_space<vmem>>, vector<64x32xbf16>
    %cst = arith.constant dense<0.000000e+00> : vector<64x32xf32>
    %7 = tpu.matmul %5, %6, %cst {dimension_numbers = #tpu.dot_dimension_numbers<[1], [0], [0], [1], [0, 0, 1, 1], [], []>} : vector<64x64xbf16>, vector<64x32xbf16>, vector<64x32xf32> -> vector<64x32xf32>
    %8 = arith.addf %3, %7 : vector<64x32xf32>
    %c0_6 = arith.constant 0 : index
    %c0_7 = arith.constant 0 : index
    %9 = vector.load %arg9[%c0_6, %c0_7] : memref<64x32xf32, #tpu.memory_space<vmem>>, vector<64x32xf32>
    tpu.vector_store %arg9[%c0_6, %c0_7], %8 {strides = array<i32>} : memref<64x32xf32, #tpu.memory_space<vmem>>, vector<64x32xf32>,
    %c0_i32_8 = arith.constant 0 : i32
    %10 = arith.cmpi eq, %arg1, %c0_i32_8 : i32
    %11 = arith.extui %10 : i1 to i32
    %c0_i32_9 = arith.constant 0 : i32
    %12 = arith.cmpi ne, %11, %c0_i32_9 : i32
    scf.if %12 {
      %c0_10 = arith.constant 0 : index
      %c0_11 = arith.constant 0 : index
      %13 = vector.load %arg9[%c0_10, %c0_11] : memref<64x32xf32, #tpu.memory_space<vmem>>, vector<64x32xf32>
      %c0_12 = arith.constant 0 : index
      %c0_13 = arith.constant 0 : index
      %14 = vector.load %arg4[%c0_12, %c0_13] : memref<1x32xf32, #tpu.memory_space<vmem>>, vector<1x32xf32>
      %15 = vector.broadcast %14 : vector<1x32xf32> to vector<64x32xf32>
      %16 = arith.addf %13, %15 : vector<64x32xf32>
      %c0_14 = arith.constant 0 : index
      %c0_15 = arith.constant 0 : index
      %17 = vector.load %arg5[%c0_14, %c0_15] : memref<64x32xf32, #tpu.memory_space<vmem>>, vector<64x32xf32>
      %18 = arith.addf %16, %17 : vector<64x32xf32>
      %cst_16 = arith.constant dense<0.000000e+00> : vector<64xf32>
      %19 = vector.multi_reduction <add>, %18, %cst_16 [1] : vector<64x32xf32> to vector<64xf32>
      %20 = vector.shape_cast %19 : vector<64xf32> to vector<64x1xf32>
      %cst_17 = arith.constant 3.200000e+01 : f32
      %21 = vector.broadcast %cst_17 : f32 to vector<64x1xf32>
      %22 = arith.divf %20, %21 : vector<64x1xf32>
      %23 = vector.broadcast %22 : vector<64x1xf32> to vector<64x32xf32>
      %24 = arith.subf %18, %23 : vector<64x32xf32>
      %25 = arith.mulf %24, %24 : vector<64x32xf32>
      %cst_18 = arith.constant dense<0.000000e+00> : vector<64xf32>
      %26 = vector.multi_reduction <add>, %25, %cst_18 [1] : vector<64x32xf32> to vector<64xf32>
      %27 = vector.shape_cast %26 : vector<64xf32> to vector<64x1xf32>
      %cst_19 = arith.constant 3.200000e+01 : f32
      %28 = vector.broadcast %cst_19 : f32 to vector<64x1xf32>
      %29 = arith.divf %27, %28 : vector<64x1xf32>
      %30 = vector.broadcast %22 : vector<64x1xf32> to vector<64x32xf32>
      %31 = arith.subf %18, %30 : vector<64x32xf32>
      %cst_20 = arith.constant 9.99999974E-6 : f32
      %32 = vector.broadcast %cst_20 : f32 to vector<64x1xf32>
      %33 = arith.addf %29, %32 : vector<64x1xf32>
      %34 = math.rsqrt %33 : vector<64x1xf32>
      %35 = vector.broadcast %34 : vector<64x1xf32> to vector<64x32xf32>
      %36 = arith.mulf %31, %35 : vector<64x32xf32>
      %c0_21 = arith.constant 0 : index
      %c0_22 = arith.constant 0 : index
      %37 = vector.load %arg6[%c0_21, %c0_22] : memref<1x32xf32, #tpu.memory_space<vmem>>, vector<1x32xf32>
      %38 = vector.broadcast %37 : vector<1x32xf32> to vector<64x32xf32>
      %39 = arith.mulf %36, %38 : vector<64x32xf32>
      %c0_23 = arith.constant 0 : index
      %c0_24 = arith.constant 0 : index
      %40 = vector.load %arg7[%c0_23, %c0_24] : memref<1x32xf32, #tpu.memory_space<vmem>>, vector<1x32xf32>
      %41 = vector.broadcast %40 : vector<1x32xf32> to vector<64x32xf32>
      %42 = arith.addf %39, %41 : vector<64x32xf32>
      %c0_25 = arith.constant 0 : index
      %c0_26 = arith.constant 0 : index
      %43 = vector.load %arg8[%c0_25, %c0_26] : memref<64x32xf32, #tpu.memory_space<vmem>>, vector<64x32xf32>
      tpu.vector_store %arg8[%c0_25, %c0_26], %42 {strides = array<i32>} : memref<64x32xf32, #tpu.memory_space<vmem>>, vector<64x32xf32>,
    } else {
    }
    return
  }
  func.func @transform_0(%arg0: i32, %arg1: i32) -> (i32, i32) {
    %c0_i32 = arith.constant 0 : i32
    return %arg0, %arg1 : i32, i32
  }
  func.func @transform_1(%arg0: i32, %arg1: i32) -> (i32, i32) {
    %c0_i32 = arith.constant 0 : i32
    %c0_i32_0 = arith.constant 0 : i32
    return %arg1, %c0_i32 : i32, i32
  }
  func.func @transform_2(%arg0: i32, %arg1: i32) -> (i32, i32) {
    %c0_i32 = arith.constant 0 : i32
    %c0_i32_0 = arith.constant 0 : i32
    %c0_i32_1 = arith.constant 0 : i32
    return %c0_i32, %c0_i32_0 : i32, i32
  }
  func.func @transform_3(%arg0: i32, %arg1: i32) -> (i32, i32) {
    %c0_i32 = arith.constant 0 : i32
    %c0_i32_0 = arith.constant 0 : i32
    return %arg0, %c0_i32 : i32, i32
  }
  func.func @transform_4(%arg0: i32, %arg1: i32) -> (i32, i32) {
    %c0_i32 = arith.constant 0 : i32
    %c0_i32_0 = arith.constant 0 : i32
    %c0_i32_1 = arith.constant 0 : i32
    return %c0_i32, %c0_i32_0 : i32, i32
  }
  func.func @transform_5(%arg0: i32, %arg1: i32) -> (i32, i32) {
    %c0_i32 = arith.constant 0 : i32
    %c0_i32_0 = arith.constant 0 : i32
    %c0_i32_1 = arith.constant 0 : i32
    return %c0_i32, %c0_i32_0 : i32, i32
  }
  func.func @transform_6(%arg0: i32, %arg1: i32) -> (i32, i32) {
    %c0_i32 = arith.constant 0 : i32
    %c0_i32_0 = arith.constant 0 : i32
    return %arg0, %c0_i32 : i32, i32
  }
}

module attributes {stable_mosaic.version = 11 : i64} {
  func.func @_linear_kernel(%arg0: i32, %arg1: i32, %arg2: i32, %arg3: memref<64x32xf32, #tpu.memory_space<vmem>>, %arg4: memref<32x16xbf16, #tpu.memory_space<vmem>>, %arg5: memref<1x16xf32, #tpu.memory_space<vmem>>, %arg6: memref<64x16xf32, #tpu.memory_space<vmem>>, %arg7: memref<64x16xf32, #tpu.memory_space<vmem>>) attributes {dimension_semantics = [#tpu.dimension_semantics<parallel>, #tpu.dimension_semantics<parallel>, #tpu.dimension_semantics<arbitrary>], iteration_bounds = array<i64: 1, 1, 1>, scalar_prefetch = 0 : i64, scratch_operands = 1 : i64, tpu.core_type = #tpu.core_type<tc>, window_params = [{transform_indices = @transform_0, window_bounds = array<i64: 64, 32>}, {transform_indices = @transform_1, window_bounds = array<i64: 32, 16>}, {transform_indices = @transform_2, window_bounds = array<i64: 1, 16>}, {transform_indices = @transform_3, window_bounds = array<i64: 64, 16>}]} {
    %c0_i32 = arith.constant 0 : i32
    %0 = arith.cmpi eq, %arg2, %c0_i32 : i32
    %1 = arith.extui %0 : i1 to i32
    %c0_i32_0 = arith.constant 0 : i32
    %2 = arith.cmpi ne, %1, %c0_i32_0 : i32
    scf.if %2 {
      %cst_10 = arith.constant 0.000000e+00 : f32
      %13 = vector.broadcast %cst_10 : f32 to vector<64x16xf32>
      %c0_11 = arith.constant 0 : index
      %c0_12 = arith.constant 0 : index
      %14 = vector.load %arg7[%c0_11, %c0_12] : memref<64x16xf32, #tpu.memory_space<vmem>>, vector<64x16xf32>
      tpu.vector_store %arg7[%c0_11, %c0_12], %13 {strides = array<i32>} : memref<64x16xf32, #tpu.memory_space<vmem>>, vector<64x16xf32>,
    } else {
    }
    %c0 = arith.constant 0 : index
    %c0_1 = arith.constant 0 : index
    %3 = vector.load %arg7[%c0, %c0_1] : memref<64x16xf32, #tpu.memory_space<vmem>>, vector<64x16xf32>
    %c0_2 = arith.constant 0 : index
    %c0_3 = arith.constant 0 : index
    %4 = vector.load %arg3[%c0_2, %c0_3] : memref<64x32xf32, #tpu.memory_space<vmem>>, vector<64x32xf32>
    %5 = arith.truncf %4 : vector<64x32xf32> to vector<64x32xbf16>
    %c0_4 = arith.constant 0 : index
    %c0_5 = arith.constant 0 : index
    %6 = vector.load %arg4[%c0_4, %c0_5] : memref<32x16xbf16, #tpu.memory_space<vmem>>, vector<32x16xbf16>
    %cst = arith.constant dense<0.000000e+00> : vector<64x16xf32>
    %7 = tpu.matmul %5, %6, %cst {dimension_numbers = #tpu.dot_dimension_numbers<[1], [0], [0], [1], [0, 0, 1, 1], [], []>} : vector<64x32xbf16>, vector<32x16xbf16>, vector<64x16xf32> -> vector<64x16xf32>
    %8 = arith.addf %3, %7 : vector<64x16xf32>
    %c0_6 = arith.constant 0 : index
    %c0_7 = arith.constant 0 : index
    %9 = vector.load %arg7[%c0_6, %c0_7] : memref<64x16xf32, #tpu.memory_space<vmem>>, vector<64x16xf32>
    tpu.vector_store %arg7[%c0_6, %c0_7], %8 {strides = array<i32>} : memref<64x16xf32, #tpu.memory_space<vmem>>, vector<64x16xf32>,
    %c0_i32_8 = arith.constant 0 : i32
    %10 = arith.cmpi eq, %arg2, %c0_i32_8 : i32
    %11 = arith.extui %10 : i1 to i32
    %c0_i32_9 = arith.constant 0 : i32
    %12 = arith.cmpi ne, %11, %c0_i32_9 : i32
    scf.if %12 {
      %c0_10 = arith.constant 0 : index
      %c0_11 = arith.constant 0 : index
      %13 = vector.load %arg7[%c0_10, %c0_11] : memref<64x16xf32, #tpu.memory_space<vmem>>, vector<64x16xf32>
      %c0_12 = arith.constant 0 : index
      %c0_13 = arith.constant 0 : index
      %14 = vector.load %arg5[%c0_12, %c0_13] : memref<1x16xf32, #tpu.memory_space<vmem>>, vector<1x16xf32>
      %15 = vector.broadcast %14 : vector<1x16xf32> to vector<64x16xf32>
      %16 = arith.addf %13, %15 : vector<64x16xf32>
      %c0_14 = arith.constant 0 : index
      %c0_15 = arith.constant 0 : index
      %17 = vector.load %arg6[%c0_14, %c0_15] : memref<64x16xf32, #tpu.memory_space<vmem>>, vector<64x16xf32>
      tpu.vector_store %arg6[%c0_14, %c0_15], %16 {strides = array<i32>} : memref<64x16xf32, #tpu.memory_space<vmem>>, vector<64x16xf32>,
    } else {
    }
    return
  }
  func.func @transform_0(%arg0: i32, %arg1: i32, %arg2: i32) -> (i32, i32) {
    %c0_i32 = arith.constant 0 : i32
    return %arg0, %arg2 : i32, i32
  }
  func.func @transform_1(%arg0: i32, %arg1: i32, %arg2: i32) -> (i32, i32) {
    %c0_i32 = arith.constant 0 : i32
    return %arg2, %arg1 : i32, i32
  }
  func.func @transform_2(%arg0: i32, %arg1: i32, %arg2: i32) -> (i32, i32) {
    %c0_i32 = arith.constant 0 : i32
    %c0_i32_0 = arith.constant 0 : i32
    return %c0_i32, %arg1 : i32, i32
  }
  func.func @transform_3(%arg0: i32, %arg1: i32, %arg2: i32) -> (i32, i32) {
    %c0_i32 = arith.constant 0 : i32
    return %arg0, %arg1 : i32, i32
  }
}

module attributes {stable_mosaic.version = 11 : i64} {
  func.func @_linear_kernel(%arg0: i32, %arg1: i32, %arg2: i32, %arg3: memref<64x32xf32, #tpu.memory_space<vmem>>, %arg4: memref<32x64xbf16, #tpu.memory_space<vmem>>, %arg5: memref<1x64xf32, #tpu.memory_space<vmem>>, %arg6: memref<64x64xf32, #tpu.memory_space<vmem>>, %arg7: memref<64x64xf32, #tpu.memory_space<vmem>>) attributes {dimension_semantics = [#tpu.dimension_semantics<parallel>, #tpu.dimension_semantics<parallel>, #tpu.dimension_semantics<arbitrary>], iteration_bounds = array<i64: 1, 1, 1>, scalar_prefetch = 0 : i64, scratch_operands = 1 : i64, tpu.core_type = #tpu.core_type<tc>, window_params = [{transform_indices = @transform_0, window_bounds = array<i64: 64, 32>}, {transform_indices = @transform_1, window_bounds = array<i64: 32, 64>}, {transform_indices = @transform_2, window_bounds = array<i64: 1, 64>}, {transform_indices = @transform_3, window_bounds = array<i64: 64, 64>}]} {
    %c0_i32 = arith.constant 0 : i32
    %0 = arith.cmpi eq, %arg2, %c0_i32 : i32
    %1 = arith.extui %0 : i1 to i32
    %c0_i32_0 = arith.constant 0 : i32
    %2 = arith.cmpi ne, %1, %c0_i32_0 : i32
    scf.if %2 {
      %cst_10 = arith.constant 0.000000e+00 : f32
      %13 = vector.broadcast %cst_10 : f32 to vector<64x64xf32>
      %c0_11 = arith.constant 0 : index
      %c0_12 = arith.constant 0 : index
      %14 = vector.load %arg7[%c0_11, %c0_12] : memref<64x64xf32, #tpu.memory_space<vmem>>, vector<64x64xf32>
      tpu.vector_store %arg7[%c0_11, %c0_12], %13 {strides = array<i32>} : memref<64x64xf32, #tpu.memory_space<vmem>>, vector<64x64xf32>,
    } else {
    }
    %c0 = arith.constant 0 : index
    %c0_1 = arith.constant 0 : index
    %3 = vector.load %arg7[%c0, %c0_1] : memref<64x64xf32, #tpu.memory_space<vmem>>, vector<64x64xf32>
    %c0_2 = arith.constant 0 : index
    %c0_3 = arith.constant 0 : index
    %4 = vector.load %arg3[%c0_2, %c0_3] : memref<64x32xf32, #tpu.memory_space<vmem>>, vector<64x32xf32>
    %5 = arith.truncf %4 : vector<64x32xf32> to vector<64x32xbf16>
    %c0_4 = arith.constant 0 : index
    %c0_5 = arith.constant 0 : index
    %6 = vector.load %arg4[%c0_4, %c0_5] : memref<32x64xbf16, #tpu.memory_space<vmem>>, vector<32x64xbf16>
    %cst = arith.constant dense<0.000000e+00> : vector<64x64xf32>
    %7 = tpu.matmul %5, %6, %cst {dimension_numbers = #tpu.dot_dimension_numbers<[1], [0], [0], [1], [0, 0, 1, 1], [], []>} : vector<64x32xbf16>, vector<32x64xbf16>, vector<64x64xf32> -> vector<64x64xf32>
    %8 = arith.addf %3, %7 : vector<64x64xf32>
    %c0_6 = arith.constant 0 : index
    %c0_7 = arith.constant 0 : index
    %9 = vector.load %arg7[%c0_6, %c0_7] : memref<64x64xf32, #tpu.memory_space<vmem>>, vector<64x64xf32>
    tpu.vector_store %arg7[%c0_6, %c0_7], %8 {strides = array<i32>} : memref<64x64xf32, #tpu.memory_space<vmem>>, vector<64x64xf32>,
    %c0_i32_8 = arith.constant 0 : i32
    %10 = arith.cmpi eq, %arg2, %c0_i32_8 : i32
    %11 = arith.extui %10 : i1 to i32
    %c0_i32_9 = arith.constant 0 : i32
    %12 = arith.cmpi ne, %11, %c0_i32_9 : i32
    scf.if %12 {
      %c0_10 = arith.constant 0 : index
      %c0_11 = arith.constant 0 : index
      %13 = vector.load %arg7[%c0_10, %c0_11] : memref<64x64xf32, #tpu.memory_space<vmem>>, vector<64x64xf32>
      %c0_12 = arith.constant 0 : index
      %c0_13 = arith.constant 0 : index
      %14 = vector.load %arg5[%c0_12, %c0_13] : memref<1x64xf32, #tpu.memory_space<vmem>>, vector<1x64xf32>
      %15 = vector.broadcast %14 : vector<1x64xf32> to vector<64x64xf32>
      %16 = arith.addf %13, %15 : vector<64x64xf32>
      %cst_14 = arith.constant 0.000000e+00 : f32
      %17 = vector.broadcast %cst_14 : f32 to vector<64x64xf32>
      %18 = arith.maximumf %16, %17 : vector<64x64xf32>
      %c0_15 = arith.constant 0 : index
      %c0_16 = arith.constant 0 : index
      %19 = vector.load %arg6[%c0_15, %c0_16] : memref<64x64xf32, #tpu.memory_space<vmem>>, vector<64x64xf32>
      tpu.vector_store %arg6[%c0_15, %c0_16], %18 {strides = array<i32>} : memref<64x64xf32, #tpu.memory_space<vmem>>, vector<64x64xf32>,
    } else {
    }
    return
  }
  func.func @transform_0(%arg0: i32, %arg1: i32, %arg2: i32) -> (i32, i32) {
    %c0_i32 = arith.constant 0 : i32
    return %arg0, %arg2 : i32, i32
  }
  func.func @transform_1(%arg0: i32, %arg1: i32, %arg2: i32) -> (i32, i32) {
    %c0_i32 = arith.constant 0 : i32
    return %arg2, %arg1 : i32, i32
  }
  func.func @transform_2(%arg0: i32, %arg1: i32, %arg2: i32) -> (i32, i32) {
    %c0_i32 = arith.constant 0 : i32
    %c0_i32_0 = arith.constant 0 : i32
    return %c0_i32, %arg1 : i32, i32
  }
  func.func @transform_3(%arg0: i32, %arg1: i32, %arg2: i32) -> (i32, i32) {
    %c0_i32 = arith.constant 0 : i32
    return %arg0, %arg1 : i32, i32
  }
}

</mosaic_0001>

<bundles_post_ra>
// kernel: bert_forward.12
= control target key start
LH: loop header
LB: loop body
LE: loop exit
PB: predicated region body
PF: predicated region fallthrough
CT: control target
= control target key end

     0   :  { %s498_s15 = smov 0   ;;  %s500_s16 = smov 0   ;;  %s543_s0 = inlined_call_operand.vmem [shape: f32[64,16], index: 0, kind: input, shape index: {}]   ;;  %s544_s1 = inlined_call_operand.vmem [shape: bf16[16,32], index: 1, kind: input, shape index: {}]   ;;  %s545_s2 = inlined_call_operand.vmem [shape: f32[1,32], index: 2, kind: input, shape index: {}]   ;;  %s546_s3 = inlined_call_operand.vmem [shape: f32[8,32], index: 3, kind: input, shape index: {}]   ;;  %s547_s4 = inlined_call_operand.vmem [shape: f32[64,32], index: 4, kind: output, shape index: {}]  }
   0x1   :  { %s502_s17 = smov 0  }
   0x2 LB: > { %s26_s18 = sadd.s32 1, %s465_s16  ;;  %p404_p0 = scmp.ge.s32.totalorder %s469_s17, 1  ;;  %s469_s17 = sphi %s502_s17, %s14_s17   ;;  %s465_s16 = sphi %s500_s16, %s549_s16   ;;  %s461_s15 = sphi %s498_s15, %s548_s15  }
   0x3   : > { %p28_p1 = scmp.ge.s32.totalorder %s26_s18, 8  ;;  %p189_p2 = scmp.lt.s32.totalorder %s469_s17, 9 }
   0x5   : > { %s551_s18 = smov (%p28_p1, %s26_s18), 0  ;;  %p190_p3 = pnand %p404_p0, %p189_p2 }
   0x6   : > { %vm243_vm0 = vcmask (!%p190_p3), 261120   ;;  %v471_v0 = vmov (!%p190_p3), 0.0   ;;  %v446_v1 = vld [vmem:[%s544_s1] sm:$0xff] (!%p190_p3)   ;;  %p221_p4 = scmp.lt.s32.totalorder (!%p190_p3), %s461_s15, 7  ;;  %vm472_vm1 = vmmov (!%p190_p3), 0   ;;  %vm256_vm2 = vcmask (!%p190_p3), 130048  }
   0x7   : > { %193 = sbr.rel (%p190_p3) target bundleno = 249 (0xf9), region = 36  ;;  %244 = vst.msk [vmem:[#allocation2] sm:$0xff] (!%p190_p3), %vm243_vm0, %v471_v0  ;;  %414 = vmatprep.subr.bf16.mxu0 (!%p190_p3), %v471_v0  ;;  %416 = vmatprep.mubr.msk.bf16.mxu0 (!%p190_p3), %vm472_vm1, %v471_v0  ;;  %v409_v10 = vld [vmem:[%s545_s2] ss:$0 sm:$0xff] (!%p190_p3) }
   0x8   : > { %415 = vmatpush3.bf16.msra.mxu0 (!%p190_p3), %v446_v1  ;;  %v316_v13 = vld [vmem:[%s546_s3] sm:$0xff] (!%p190_p3) }
   0xe   : > { %s553_s15 = smov (!%p221_p4, %s461_s15), 7  ;;  %v245_v4 = vld [vmem:[#allocation2] sm:$0xff] }
   0xf   : > { %s405_s21 = sshll.u32 %s553_s15, 3 }
  0x10   : > { %s227_s24 = scalar_lea.vmem %s543_s0, %s405_s21  ;;  %s237_s5 = scalar_lea.vmem %s547_s4, %s405_s21 }
  0x11   : > { %v246_v2 = vld [vmem:[%s227_s24] sm:$0xff] }
  0x12   : > { %v247_v3 = vpack.c.bf16 %v246_v2, %v246_v2 }
  0x14   : > { %417 = vmatmul.mubr.msk.bf16.vlgmr.msra.gmra.mrb[0].mxu0 %vm256_vm2, %v247_v3 }
  0xe7   : > { %v294_v5 = vpop.f32.mrb[0].mxu0 }
  0xe8   : > { %v300_v6 = vadd.f32 %v294_v5, %v245_v4  ;;  %v418_v7 = vpop.f32.mrb[1].mxu0 }
  0xe9   : > { %v297_v8 = vpop.f32.mrb[2].mxu0 }
  0xea   : > { %302 = vst.msk [vmem:[#allocation2] sm:$0xff] %vm243_vm0, %v300_v6  ;;  %v419_v9 = vpop.f32.mrb[3].mxu0 }
  0xf1   : > { %v306_v11 = vld [vmem:[#allocation2] sm:$0xff] }
  0xf2   : > { %v314_v12 = vadd.f32 %v409_v10, %v306_v11 }
  0xf4   : > { %v315_v14 = vmul.f32 5.656854, %v314_v12 }
  0xf6   : > { %v317_v15 = vadd.f32 %v316_v13, %v315_v14 }
  0xf8   : > { %318 = vst.msk [vmem:[%s237_s5] sm:$0xff] %vm243_vm0, %v317_v15 }
  0xf9 PF: > { %s14_s17 = sadd.s32 1, %s469_s17   ;;  %s548_s15 = smov %s465_s16 }
  0xfa   : > { %p11_p5 = scmp.ge.s32.totalorder %s14_s17, 10   ;;  %s549_s16 = smov %s551_s18 }
  0xfc   :  { %13 = sbr.rel (!%p11_p5) target bundleno = 2 (0x2), region = 77 }

// kernel: bert_forward.13
= control target key start
LH: loop header
LB: loop body
LE: loop exit
PB: predicated region body
PF: predicated region fallthrough
CT: control target
= control target key end

     0   :  { %vm19_vm0 = vcmask 785408   ;;  %v229_v1 = vmov 0.0   ;;  %vm64_vm1 = vcmask 261120   ;;  %s335_s1 = inlined_call_operand.vmem [shape: bf16[32,96], index: 1, kind: input, shape index: {}]   ;;  %s336_s0 = inlined_call_operand.vmem [shape: f32[64,32], index: 0, kind: input, shape index: {}]   ;;  %s337_s2 = inlined_call_operand.vmem [shape: f32[1,96], index: 2, kind: input, shape index: {}]   ;;  %s338_s3 = inlined_call_operand.vmem [shape: f32[64,96], index: 3, kind: output, shape index: {}]  }
   0x1   :  { %v227_v0 = vld [vmem:[%s335_s1] sm:$0xff]   ;;  %22 = vst.msk [vmem:[#allocation2 + $0x10] sm:$0xff] %vm19_vm0, %v229_v1  ;;  %20 = vst.msk [vmem:[#allocation2] sm:$0xff] %vm19_vm0, %v229_v1  ;;  %v228_v2 = vld [vmem:[%s335_s1 + $0x8] sm:$0xff]  }
   0x2   :  { %21 = vst.msk [vmem:[#allocation2 + $0x8] sm:$0xff] %vm19_vm0, %v229_v1  ;;  %23 = vst.msk [vmem:[#allocation2 + $0x18] sm:$0xff] %vm19_vm0, %v229_v1  ;;  %210 = vmatprep.subr.bf16.mxu0 %v227_v0  ;;  %222 = vmatprep.subr.bf16.mxu1 %v227_v0  ;;  %v36_v3 = vld [vmem:[%s336_s0] sm:$0xff]  ;;  %v37_v4 = vld [vmem:[%s336_s0 + $0x8] sm:$0xff] }
   0x3   :  { %24 = vst.msk [vmem:[#allocation2 + $0x20] sm:$0xff] %vm19_vm0, %v229_v1  ;;  %25 = vst.msk [vmem:[#allocation2 + $0x28] sm:$0xff] %vm19_vm0, %v229_v1  ;;  %v40_v5 = vld [vmem:[%s336_s0 + $0x20] sm:$0xff]  ;;  %211 = vmatpush3.bf16.msra.mxu0 %v227_v0  ;;  %224 = vmatpush3.bf16.msra.mxu1 %v227_v0  ;;  %v44_v6 = vpack.c.bf16 %v37_v4, %v36_v3  ;;  %v41_v7 = vld [vmem:[%s336_s0 + $0x28] sm:$0xff] }
   0x4   :  { %26 = vst.msk [vmem:[#allocation2 + $0x30] sm:$0xff] %vm19_vm0, %v229_v1  ;;  %27 = vst.msk [vmem:[#allocation2 + $0x38] sm:$0xff] %vm19_vm0, %v229_v1  ;;  %v38_v8 = vld [vmem:[%s336_s0 + $0x10] sm:$0xff]  ;;  %v39_v9 = vld [vmem:[%s336_s0 + $0x18] sm:$0xff]  ;;  %212 = vmatprep.subr.bf16.mxu0 %v228_v2  ;;  %223 = vmatprep.subr.bf16.mxu1 %v228_v2  ;;  %v46_v10 = vpack.c.bf16 %v41_v7, %v40_v5 }
   0x5   :  { %v42_v11 = vld [vmem:[%s336_s0 + $0x30] sm:$0xff]  ;;  %v43_v12 = vld [vmem:[%s336_s0 + $0x38] sm:$0xff]  ;;  %214 = vmatprep.mubr.msk.bf16.mxu0 %vm64_vm1, %v44_v6  ;;  %v45_v13 = vpack.c.bf16 %v39_v9, %v38_v8  ;;  %v203_v39 = vld [vmem:[%s337_s2] ss:$0 sm:$0xff] }
   0x6   :  { %218 = vmatprep.mubr.msk.bf16.mxu1 %vm64_vm1, %v46_v10  ;;  %v47_v14 = vpack.c.bf16 %v43_v12, %v42_v11 }
   0x7   :  { %213 = vmatpush3.bf16.msra.mxu0 %v228_v2  ;;  %225 = vmatpush3.bf16.msra.mxu1 %v228_v2 }
   0x8   :  { %v30_v15 = vld [vmem:[#allocation2 + $0x10] sm:$0xff]  ;;  %v28_v17 = vld [vmem:[#allocation2] sm:$0xff] }
   0x9   :  { %v31_v21 = vld [vmem:[#allocation2 + $0x18] sm:$0xff]  ;;  %v29_v27 = vld [vmem:[#allocation2 + $0x8] sm:$0xff] }
   0xa   :  { %215 = vmatmul.mubr.msk.bf16.vlgmr.msra.gmra.mrb[0].mxu0 %vm64_vm1, %v45_v13  ;;  %219 = vmatmul.mubr.msk.bf16.vlgmr.msra.gmra.mrb[0].mxu1 %vm64_vm1, %v47_v14  ;;  %v32_v18 = vld [vmem:[#allocation2 + $0x20] sm:$0xff]  ;;  %v33_v28 = vld [vmem:[#allocation2 + $0x28] sm:$0xff] }
   0xb   :  { %v34_v16 = vld [vmem:[#allocation2 + $0x30] sm:$0xff]  ;;  %v35_v22 = vld [vmem:[#allocation2 + $0x38] sm:$0xff] }
  0xdd   :  { %v216_v19 = vpop.f32.mrb[0].mxu0  ;;  %v220_v20 = vpop.f32.mrb[0].mxu1 }
  0xde   :  { %v144_v23 = vadd.f32 %v216_v19, %v30_v15  ;;  %v148_v24 = vadd.f32 %v220_v20, %v34_v16  ;;  %v111_v25 = vpop.f32.mrb[1].mxu0  ;;  %v127_v26 = vpop.f32.mrb[1].mxu1 }
  0xdf   :  { %v142_v29 = vadd.f32 %v111_v25, %v28_v17  ;;  %v146_v30 = vadd.f32 %v127_v26, %v32_v18  ;;  %v217_v31 = vpop.f32.mrb[2].mxu0  ;;  %v221_v32 = vpop.f32.mrb[2].mxu1 }
  0xe0   :  { %153 = vst.msk [vmem:[#allocation2 + $0x10] sm:$0xff] %vm19_vm0, %v144_v23  ;;  %157 = vst.msk [vmem:[#allocation2 + $0x30] sm:$0xff] %vm19_vm0, %v148_v24  ;;  %v145_v33 = vadd.f32 %v217_v31, %v31_v21  ;;  %v149_v34 = vadd.f32 %v221_v32, %v35_v22  ;;  %v114_v35 = vpop.f32.mrb[3].mxu0  ;;  %v130_v36 = vpop.f32.mrb[3].mxu1 }
  0xe1   :  { %151 = vst.msk [vmem:[#allocation2] sm:$0xff] %vm19_vm0, %v142_v29  ;;  %155 = vst.msk [vmem:[#allocation2 + $0x20] sm:$0xff] %vm19_vm0, %v146_v30  ;;  %v143_v37 = vadd.f32 %v114_v35, %v29_v27  ;;  %v147_v38 = vadd.f32 %v130_v36, %v33_v28 }
  0xe2   :  { %154 = vst.msk [vmem:[#allocation2 + $0x18] sm:$0xff] %vm19_vm0, %v145_v33  ;;  %158 = vst.msk [vmem:[#allocation2 + $0x38] sm:$0xff] %vm19_vm0, %v149_v34 }
  0xe3   :  { %152 = vst.msk [vmem:[#allocation2 + $0x8] sm:$0xff] %vm19_vm0, %v143_v37  ;;  %156 = vst.msk [vmem:[#allocation2 + $0x28] sm:$0xff] %vm19_vm0, %v147_v38 }
  0xe7   :  { %v164_v40 = vld [vmem:[#allocation2 + $0x10] sm:$0xff] }
  0xe8   :  { %v168_v41 = vld [vmem:[#allocation2 + $0x30] sm:$0xff]  ;;  %v179_v42 = vadd.f32 %v203_v39, %v164_v40  ;;  %v162_v44 = vld [vmem:[#allocation2] sm:$0xff] }
  0xe9   :  { %v183_v43 = vadd.f32 %v203_v39, %v168_v41  ;;  %v166_v45 = vld [vmem:[#allocation2 + $0x20] sm:$0xff]  ;;  %v177_v46 = vadd.f32 %v203_v39, %v162_v44  ;;  %v165_v48 = vld [vmem:[#allocation2 + $0x18] sm:$0xff] }
  0xea   :  { %v181_v47 = vadd.f32 %v203_v39, %v166_v45  ;;  %v169_v49 = vld [vmem:[#allocation2 + $0x38] sm:$0xff]  ;;  %187 = vst.msk [vmem:[%s338_s3 + $0x10] sm:$0xff] %vm19_vm0, %v179_v42  ;;  %v180_v50 = vadd.f32 %v203_v39, %v165_v48  ;;  %v163_v52 = vld [vmem:[#allocation2 + $0x8] sm:$0xff] }
  0xeb   :  { %191 = vst.msk [vmem:[%s338_s3 + $0x30] sm:$0xff] %vm19_vm0, %v183_v43  ;;  %v184_v51 = vadd.f32 %v203_v39, %v169_v49  ;;  %v167_v53 = vld [vmem:[#allocation2 + $0x28] sm:$0xff]  ;;  %185 = vst.msk [vmem:[%s338_s3] sm:$0xff] %vm19_vm0, %v177_v46  ;;  %v178_v54 = vadd.f32 %v203_v39, %v163_v52 }
  0xec   :  { %189 = vst.msk [vmem:[%s338_s3 + $0x20] sm:$0xff] %vm19_vm0, %v181_v47  ;;  %v182_v55 = vadd.f32 %v203_v39, %v167_v53  ;;  %188 = vst.msk [vmem:[%s338_s3 + $0x18] sm:$0xff] %vm19_vm0, %v180_v50 }
  0xed   :  { %192 = vst.msk [vmem:[%s338_s3 + $0x38] sm:$0xff] %vm19_vm0, %v184_v51  ;;  %186 = vst.msk [vmem:[%s338_s3 + $0x8] sm:$0xff] %vm19_vm0, %v178_v54 }
  0xee   :  { %190 = vst.msk [vmem:[%s338_s3 + $0x28] sm:$0xff] %vm19_vm0, %v182_v55 }

// kernel: bert_forward.14
= control target key start
LH: loop header
LB: loop body
LE: loop exit
PB: predicated region body
PF: predicated region fallthrough
CT: control target
= control target key end

     0   :  { %s795_s6 = smov 0   ;;  %s899_s0 = inlined_call_operand.vmem [shape: f32[8,8,96], index: 0, kind: input, shape index: {}]   ;;  %s900_s1 = inlined_call_operand.vmem [shape: f32[8,8,32], index: 1, kind: output, shape index: {}]  }
   0x1 LB: > { %s640_s7 = sadd.s32 4294967295, %s767_s6   ;;  %p644_p0 = scmp.ge.s32.totalorder %s767_s6, 1  ;;  %s767_s6 = sphi %s795_s6, %s11_s6  }
   0x2   : > { %p86_p1 = scmp.lt.s32.totalorder %s767_s6, 9 }
   0x4   : > { %p87_p2 = pnand %p644_p0, %p86_p1 }
   0x5   : > { %p104_p3 = scmp.lt.s32.totalorder (!%p87_p2), %s640_s7, 7  ;;  %v769_v0 = vmov (!%p87_p2), 0.0   ;;  %vm770_vm0 = vmmov (!%p87_p2), 0   ;;  %s771_s12 = smov (!%p87_p2), 96   ;;  %vm125_vm1 = vcmask (!%p87_p2), 64512   ;;  %v114_v7 = vlaneseq (!%p87_p2) }
   0x6   : > { %90 = sbr.rel (%p87_p2) target bundleno = 1598 (0x63e), region = 24  ;;  %673 = vmatprep.subr.bf16.mxu0 (!%p87_p2), %v769_v0  ;;  %675 = vmatprep.mubr.msk.bf16.mxu0 (!%p87_p2), %vm770_vm0, %v769_v0  ;;  %s772_s13 = smov (!%p87_p2), 64   ;;  %vm190_vm3 = vcmask (!%p87_p2), 1043456   ;;  %vm581_vm4 = vcmask (!%p87_p2), 130048   ;;  %vm583_vm5 = vcmask (!%p87_p2), 195584   ;;  %vm585_vm6 = vcmask (!%p87_p2), 261120  }
   0x7   : > { %679 = vmatprep.subr.bf16.mxu1 (!%p87_p2), %v769_v0  ;;  %681 = vmatprep.mubr.msk.bf16.mxu1 (!%p87_p2), %vm770_vm0, %v769_v0  ;;  %s773_s14 = smov (!%p87_p2), 88   ;;  %v827_v8 = vshrl.u32 (!%p87_p2), %v114_v7, 7  ;;  %v829_v9 = vand.u32 (!%p87_p2), 127, %v114_v7  ;;  %s774_s15 = smov (!%p87_p2), 72  }
   0x8   : > { %s775_s16 = smov (!%p87_p2), 120   ;;  %s776_s17 = smov (!%p87_p2), 80  }
   0x9   : > { %vm118_vm2 = vcmp.ge.s32.totalorder (!%p87_p2), %v827_v8, %v829_v9  ;;  %s777_s18 = smov (!%p87_p2), 112   ;;  %s778_s19 = smov (!%p87_p2), 104  }
   0xa   : > { %s779_s20 = smov (!%p87_p2), 56   ;;  %s780_s21 = smov (!%p87_p2), 48  }
   0xb   : > { %s781_s22 = smov (!%p87_p2), 40   ;;  %s782_s23 = smov (!%p87_p2), 8  }
   0xc   : > { %s783_s24 = smov (!%p87_p2), 16   ;;  %s784_s25 = smov (!%p87_p2), 24  }
   0xd   : > { %s902_s7 = smov (!%p104_p3, %s640_s7), 7 }
   0xe   : > { %s645_s8 = sshll.u32 %s902_s7, 3 }
   0xf   : > { %s107_s11 = scalar_lea.vmem %s899_s0, %s645_s8  ;;  %s111_s28 = scalar_lea.vmem %s900_s1, %s645_s8 }
  0x10   : > { %v113_v1 = vld [vmem:[%s107_s11] sm:$0xff] }
  0x11   : > { %v817_v2 = vpack.c.bf16 %v113_v1, %v113_v1  ;;  %v119_v5 = vmul.f32 0.35355338, %v113_v1 }
  0x13   : > { %123 = vrot.lane.b32.xlu0 %v817_v2, %s771_s12  ;;  %v120_v6 = vpack.c.bf16 %v119_v5, %v119_v5  ;;  %185 = vrot.lane.b32.xlu1 %v817_v2, %s772_s13 }
  0x17   : > { %237 = vrot.lane.b32.xlu1 %v817_v2, %s773_s14 }
  0x85   : > { %v124_v3 = vpop.permute.xlu0 %123  ;;  %v186_v16 = vpop.permute.xlu1 %185 }
  0x86   : > { %v130_v4 = vsel %vm125_vm1, %v124_v3, 0  ;;  %v192_v17 = vsel %vm190_vm3, %v186_v16, 0 }
  0x87   : > { %674 = vmatpush3.bf16.xpose.msra.mxu0 %v130_v4  ;;  %680 = vmatpush3.bf16.msra.mxu1 %v192_v17 }
  0x88   : > { %691 = vmatprep.subr.bf16.mxu0 %v769_v0  ;;  %685 = vmatprep.subr.bf16.mxu1 %v769_v0 }
  0x89   : > { %v238_v23 = vpop.permute.xlu1 %237 }
  0x8a   : > { %v243_v29 = vsel %vm125_vm1, %v238_v23, 0 }
  0x8e   : > { %676 = vmatmul.mubr.msk.bf16.vlgmr.msra.gmra.mrb[0].mxu0 %vm125_vm1, %v120_v6 }
  0x8f   : > { %693 = vmatprep.mubr.msk.bf16.mxu0 %vm770_vm0, %v769_v0 }
 0x161   : > { %v166_v10 = vpop.f32.mrb[0].mxu0 }
 0x162   : > { %v172_v11 = vsel %vm118_vm2, %v166_v10, -inf  ;;  %v677_v12 = vpop.f32.mrb[1].mxu0 }
 0x163   : > { %v169_v13 = vpop.f32.mrb[2].mxu0  ;;  %v173_v14 = vsel %vm125_vm1, %v172_v11, -inf }
 0x164   : > { %174 = vmax.xlane.f32.xlu0 %v173_v14  ;;  %v678_v15 = vpop.f32.mrb[3].mxu0 }
 0x17a   : > { %459 = vrot.lane.b32.xlu0 %v817_v2, %s774_s15 }
 0x1f1   : > { %v175_v18 = vpop.xlane.xlu0 %174 }
 0x1f2   : > { %v176_v19 = vsub.f32 %v172_v11, %v175_v18 }
 0x1f4   : > { %v177_v20 = vmul.f32 1.442695, %v176_v19 }
 0x1f5   : > { %v460_v32 = vpop.permute.xlu0 %459 }
 0x1f6   : > { %745 = vpow2.f32 %v177_v20  ;;  %v465_v34 = vsel %vm125_vm1, %v460_v32, 0 }
 0x200   : > { %v746_v21 = vpop.eup %745 }
 0x201   : > { %v179_v22 = vsel %vm125_vm1, %v746_v21, 0.0 }
 0x202   : > { %180 = vadd.xlane.f32.xlu1 %v179_v22 }
 0x213   : > { %235 = vrot.lane.b32.xlu1 %v120_v6, %s775_s16 }
 0x217   : > { %348 = vrot.lane.b32.xlu1 %v817_v2, %s776_s17 }
 0x21b   : > { %346 = vrot.lane.b32.xlu1 %v120_v6, %s777_s18 }
 0x21f   : > { %457 = vrot.lane.b32.xlu1 %v120_v6, %s778_s19 }
 0x28f   : > { %v181_v24 = vpop.xlane.xlu1 %180 }
 0x290   : > { %747 = vrcp.f32 %v181_v24 }
 0x293   : > { %v236_v27 = vpop.permute.xlu1 %235 }
 0x297   : > { %v349_v30 = vpop.permute.xlu1 %348 }
 0x298   : > { %v354_v31 = vsel %vm125_vm1, %v349_v30, 0 }
 0x29a   : > { %v748_v25 = vpop.eup %747 }
 0x29b   : > { %v183_v26 = vmul.f32 %v748_v25, %v746_v21  ;;  %v347_v33 = vpop.permute.xlu1 %346 }
 0x29d   : > { %v184_v28 = vpack.c.bf16 %v183_v26, %v183_v26 }
 0x29f   : > { %682 = vmatmul.mubr.msk.bf16.vlgmr.msra.gmra.mrb[0].mxu1 %vm125_vm1, %v184_v28  ;;  %v458_v35 = vpop.permute.xlu1 %457 }
 0x2a0   : > { %686 = vmatpush3.bf16.xpose.msra.mxu1 %v243_v29  ;;  %687 = vmatprep.mubr.msk.bf16.mxu1 %vm770_vm0, %v769_v0 }
 0x2a1   : > { %697 = vmatprep.subr.bf16.mxu1 %v769_v0 }
 0x2a7   : > { %688 = vmatmul.mubr.msk.bf16.vlgmr.msra.gmra.mrb[4].mxu1 %vm125_vm1, %v236_v27 }
 0x2a8   : > { %698 = vmatpush3.bf16.xpose.msra.mxu1 %v354_v31  ;;  %699 = vmatprep.mubr.msk.bf16.mxu1 %vm770_vm0, %v769_v0 }
 0x2a9   : > { %709 = vmatprep.subr.bf16.mxu1 %v769_v0 }
 0x2af   : > { %700 = vmatmul.mubr.msk.bf16.vlgmr.msra.gmra.mrb[8].mxu1 %vm125_vm1, %v347_v33 }
 0x2b0   : > { %710 = vmatpush3.bf16.xpose.msra.mxu1 %v465_v34  ;;  %711 = vmatprep.mubr.msk.bf16.mxu1 %vm770_vm0, %v769_v0 }
 0x2b7   : > { %712 = vmatmul.mubr.msk.bf16.vlgmr.msra.gmra.mrb[12].mxu1 %vm125_vm1, %v458_v35 }
 0x372   : > { %v857_v36 = vpop.f32.mrb[0].mxu1 }
 0x373   : > { %v683_v37 = vpop.f32.mrb[1].mxu1 }
 0x374   : > { %v231_v38 = vpop.f32.mrb[2].mxu1 }
 0x375   : > { %v684_v39 = vpop.f32.mrb[3].mxu1 }
 0x37a   : > { %v279_v40 = vpop.f32.mrb[4].mxu1 }
 0x37b   : > { %v285_v41 = vsel %vm118_vm2, %v279_v40, -inf  ;;  %v689_v42 = vpop.f32.mrb[5].mxu1 }
 0x37c   : > { %v282_v43 = vpop.f32.mrb[6].mxu1  ;;  %v286_v44 = vsel %vm125_vm1, %v285_v41, -inf }
 0x37d   : > { %287 = vmax.xlane.f32.xlu1 %v286_v44  ;;  %v690_v45 = vpop.f32.mrb[7].mxu1 }
 0x382   : > { %v390_v46 = vpop.f32.mrb[8].mxu1 }
 0x383   : > { %v396_v47 = vsel %vm118_vm2, %v390_v46, -inf  ;;  %v701_v48 = vpop.f32.mrb[9].mxu1 }
 0x384   : > { %v397_v49 = vsel %vm125_vm1, %v396_v47, -inf  ;;  %v393_v50 = vpop.f32.mrb[10].mxu1 }
 0x385   : > { %398 = vmax.xlane.f32.xlu0 %v397_v49  ;;  %v702_v51 = vpop.f32.mrb[11].mxu1 }
 0x38a   : > { %v501_v52 = vpop.f32.mrb[12].mxu1 }
 0x38b   : > { %v507_v53 = vsel %vm118_vm2, %v501_v52, -inf  ;;  %v713_v54 = vpop.f32.mrb[13].mxu1 }
 0x38c   : > { %v508_v55 = vsel %vm125_vm1, %v507_v53, -inf  ;;  %v504_v56 = vpop.f32.mrb[14].mxu1 }
 0x38d   : > { %509 = vmax.xlane.f32.xlu1 %v508_v55  ;;  %v714_v57 = vpop.f32.mrb[15].mxu1 }
 0x40a   : > { %v288_v58 = vpop.xlane.xlu1 %287 }
 0x40b   : > { %v289_v59 = vsub.f32 %v285_v41, %v288_v58 }
 0x40d   : > { %v290_v60 = vmul.f32 1.442695, %v289_v59 }
 0x40f   : > { %749 = vpow2.f32 %v290_v60 }
 0x412   : > { %v399_v6 = vpop.xlane.xlu0 %398 }
 0x413   : > { %v400_v7 = vsub.f32 %v396_v47, %v399_v6 }
 0x415   : > { %v401_v8 = vmul.f32 1.442695, %v400_v7 }
 0x419   : > { %v750_v61 = vpop.eup %749 }
 0x41a   : > { %v510_v62 = vpop.xlane.xlu1 %509  ;;  %v292_v63 = vsel %vm125_vm1, %v750_v61, 0.0 }
 0x41b   : > { %v511_v1 = vsub.f32 %v507_v53, %v510_v62  ;;  %293 = vadd.xlane.f32.xlu1 %v292_v63 }
 0x41d   : > { %v512_v3 = vmul.f32 1.442695, %v511_v1 }
 0x41f   : > { %751 = vpow2.f32 %v512_v3 }
 0x420   : > { %753 = vpow2.f32 %v401_v8 }
 0x429   : > { %v752_v4 = vpop.eup %751 }
 0x42a   : > { %v514_v5 = vsel %vm125_vm1, %v752_v4, 0.0  ;;  %v754_v9 = vpop.eup %753 }
 0x42b   : > { %515 = vadd.xlane.f32.xlu0 %v514_v5  ;;  %v403_v10 = vsel %vm125_vm1, %v754_v9, 0.0 }
 0x42c   : > { %298 = vrot.lane.b32.xlu1 %v817_v2, %s779_s20 }
 0x441   : > { %409 = vrot.lane.b32.xlu0 %v817_v2, %s780_s21 }
 0x450   : > { %404 = vadd.xlane.f32.xlu1 %v403_v10 }
 0x461   : > { %520 = vrot.lane.b32.xlu1 %v817_v2, %s781_s22 }
 0x4a8   : > { %v294_v11 = vpop.xlane.xlu1 %293 }
 0x4a9   : > { %755 = vrcp.f32 %v294_v11 }
 0x4ac   : > { %v299_v12 = vpop.permute.xlu1 %298 }
 0x4ad   : > { %v304_v13 = vsel %vm190_vm3, %v299_v12, 0 }
 0x4ae   : > { %692 = vmatpush3.bf16.msra.mxu0 %v304_v13 }
 0x4af   : > { %703 = vmatprep.subr.bf16.mxu0 %v769_v0 }
 0x4b3   : > { %v756_v14 = vpop.eup %755 }
 0x4b4   : > { %v296_v15 = vmul.f32 %v756_v14, %v750_v61 }
 0x4b6   : > { %v297_v16 = vpack.c.bf16 %v296_v15, %v296_v15 }
 0x4b8   : > { %694 = vmatmul.mubr.msk.bf16.vlgmr.msra.gmra.mrb[4].mxu0 %vm125_vm1, %v297_v16  ;;  %v516_v17 = vpop.xlane.xlu0 %515 }
 0x4b9   : > { %705 = vmatprep.mubr.msk.bf16.mxu0 %vm770_vm0, %v769_v0 }
 0x4bc   : > { %v410_v18 = vpop.permute.xlu0 %409 }
 0x4bd   : > { %v415_v2 = vsel %vm190_vm3, %v410_v18, 0 }
 0x4be   : > { %704 = vmatpush3.bf16.msra.mxu0 %v415_v2 }
 0x4bf   : > { %715 = vmatprep.subr.bf16.mxu0 %v769_v0 }
 0x4dd   : > { %v405_v19 = vpop.xlane.xlu1 %404 }
 0x4de   : > { %757 = vrcp.f32 %v405_v19 }
 0x4df   : > { %759 = vrcp.f32 %v516_v17 }
 0x4e1   : > { %v521_v21 = vpop.permute.xlu1 %520 }
 0x4e2   : > { %v526_v23 = vsel %vm190_vm3, %v521_v21, 0 }
 0x4e8   : > { %v758_v20 = vpop.eup %757 }
 0x4e9   : > { %v407_v22 = vmul.f32 %v758_v20, %v754_v9  ;;  %v760_v25 = vpop.eup %759 }
 0x4ea   : > { %v518_v26 = vmul.f32 %v760_v25, %v752_v4 }
 0x4eb   : > { %v408_v24 = vpack.c.bf16 %v407_v22, %v407_v22 }
 0x4ec   : > { %v519_v27 = vpack.c.bf16 %v518_v26, %v518_v26 }
 0x4ed   : > { %706 = vmatmul.mubr.msk.bf16.vlgmr.msra.gmra.mrb[8].mxu0 %vm125_vm1, %v408_v24 }
 0x4ee   : > { %716 = vmatpush3.bf16.msra.mxu0 %v526_v23  ;;  %717 = vmatprep.mubr.msk.bf16.mxu0 %vm770_vm0, %v769_v0 }
 0x4f5   : > { %718 = vmatmul.mubr.msk.bf16.vlgmr.msra.gmra.mrb[12].mxu0 %vm125_vm1, %v519_v27 }
 0x58b   : > { %v340_v28 = vpop.f32.mrb[4].mxu0 }
 0x58c   : > { %569 = vrot.lane.b32.xlu1 %v340_v28, %s782_s23  ;;  %v695_v29 = vpop.f32.mrb[5].mxu0 }
 0x58d   : > { %v343_v30 = vpop.f32.mrb[6].mxu0 }
 0x58e   : > { %v696_v31 = vpop.f32.mrb[7].mxu0 }
 0x5c0   : > { %v451_v32 = vpop.f32.mrb[8].mxu0 }
 0x5c1   : > { %573 = vrot.lane.b32.xlu0 %v451_v32, %s783_s24  ;;  %v707_v33 = vpop.f32.mrb[9].mxu0 }
 0x5c2   : > { %v454_v34 = vpop.f32.mrb[10].mxu0 }
 0x5c3   : > { %v708_v35 = vpop.f32.mrb[11].mxu0 }
 0x5c8   : > { %v562_v37 = vpop.f32.mrb[12].mxu0 }
 0x5c9   : > { %577 = vrot.lane.b32.xlu1 %v562_v37, %s784_s25  ;;  %v719_v0 = vpop.f32.mrb[13].mxu0 }
 0x5ca   : > { %v565_v38 = vpop.f32.mrb[14].mxu0 }
 0x5cb   : > { %v720_v39 = vpop.f32.mrb[15].mxu0 }
 0x5fe   : > { %v570_v40 = vpop.permute.xlu1 %569 }
 0x5ff   : > { %v580_v42 = vsel %vm125_vm1, %v857_v36, %v570_v40 }
 0x633   : > { %v574_v41 = vpop.permute.xlu0 %573 }
 0x634   : > { %v582_v43 = vsel %vm581_vm4, %v580_v42, %v574_v41 }
 0x63b   : > { %v578_v44 = vpop.permute.xlu1 %577 }
 0x63c   : > { %v584_v45 = vsel %vm583_vm5, %v582_v43, %v578_v44 }
 0x63d   : > { %586 = vst.msk [vmem:[%s111_s28] sm:$0xff] %vm585_vm6, %v584_v45 }
 0x63e PF: > { %s11_s6 = sadd.s32 1, %s767_s6  }
 0x63f   : > { %p8_p4 = scmp.ge.s32.totalorder %s11_s6, 10  }
 0x641   :  { %10 = sbr.rel (!%p8_p4) target bundleno = 1 (0x1), region = 54 }

// kernel: bert_forward.15
= control target key start
LH: loop header
LB: loop body
LE: loop exit
PB: predicated region body
PF: predicated region fallthrough
CT: control target
= control target key end

     0   :  { %vm28_vm0 = vcmask 261120   ;;  %v406_v1 = vmov 0.0   ;;  %s613_s1 = inlined_call_operand.vmem [shape: bf16[32,32], index: 1, kind: input, shape index: {}]   ;;  %s614_s0 = inlined_call_operand.vmem [shape: f32[64,32], index: 0, kind: input, shape index: {}]   ;;  %s615_s2 = inlined_call_operand.vmem [shape: f32[1,32], index: 2, kind: input, shape index: {}]   ;;  %s616_s3 = inlined_call_operand.vmem [shape: f32[64,32], index: 3, kind: input, shape index: {}]   ;;  %s617_s4 = inlined_call_operand.vmem [shape: f32[1,32], index: 4, kind: input, shape index: {}]   ;;  %s618_s5 = inlined_call_operand.vmem [shape: f32[1,32], index: 5, kind: input, shape index: {}]   ;;  %s619_s6 = inlined_call_operand.vmem [shape: f32[64,32], index: 6, kind: output, shape index: {}]  }
   0x1   :  { %v388_v0 = vld [vmem:[%s613_s1] sm:$0xff]   ;;  %31 = vst.msk [vmem:[#allocation2 + $0x10] sm:$0xff] %vm28_vm0, %v406_v1  ;;  %29 = vst.msk [vmem:[#allocation2] sm:$0xff] %vm28_vm0, %v406_v1  ;;  %v389_v2 = vld [vmem:[%s613_s1 + $0x8] sm:$0xff]  }
   0x2   :  { %30 = vst.msk [vmem:[#allocation2 + $0x8] sm:$0xff] %vm28_vm0, %v406_v1  ;;  %32 = vst.msk [vmem:[#allocation2 + $0x18] sm:$0xff] %vm28_vm0, %v406_v1  ;;  %371 = vmatprep.subr.bf16.mxu0 %v388_v0  ;;  %383 = vmatprep.subr.bf16.mxu1 %v388_v0  ;;  %v45_v3 = vld [vmem:[%s614_s0] sm:$0xff]  ;;  %v46_v4 = vld [vmem:[%s614_s0 + $0x8] sm:$0xff] }
   0x3   :  { %33 = vst.msk [vmem:[#allocation2 + $0x20] sm:$0xff] %vm28_vm0, %v406_v1  ;;  %34 = vst.msk [vmem:[#allocation2 + $0x28] sm:$0xff] %vm28_vm0, %v406_v1  ;;  %v47_v5 = vld [vmem:[%s614_s0 + $0x10] sm:$0xff]  ;;  %372 = vmatpush3.bf16.msra.mxu0 %v388_v0  ;;  %385 = vmatpush3.bf16.msra.mxu1 %v388_v0  ;;  %v53_v6 = vpack.c.bf16 %v46_v4, %v45_v3  ;;  %v48_v7 = vld [vmem:[%s614_s0 + $0x18] sm:$0xff] }
   0x4   :  { %35 = vst.msk [vmem:[#allocation2 + $0x30] sm:$0xff] %vm28_vm0, %v406_v1  ;;  %36 = vst.msk [vmem:[#allocation2 + $0x38] sm:$0xff] %vm28_vm0, %v406_v1  ;;  %v49_v8 = vld [vmem:[%s614_s0 + $0x20] sm:$0xff]  ;;  %v50_v9 = vld [vmem:[%s614_s0 + $0x28] sm:$0xff]  ;;  %373 = vmatprep.subr.bf16.mxu0 %v389_v2  ;;  %384 = vmatprep.subr.bf16.mxu1 %v389_v2  ;;  %v54_v13 = vpack.c.bf16 %v48_v7, %v47_v5 }
   0x5   :  { %v55_v10 = vpack.c.bf16 %v50_v9, %v49_v8  ;;  %v51_v11 = vld [vmem:[%s614_s0 + $0x30] sm:$0xff]  ;;  %v52_v12 = vld [vmem:[%s614_s0 + $0x38] sm:$0xff]  ;;  %375 = vmatprep.mubr.msk.bf16.mxu0 %vm28_vm0, %v53_v6  ;;  %v362_v39 = vld [vmem:[%s615_s2] ss:$0 sm:$0xff] }
   0x6   :  { %v56_v14 = vpack.c.bf16 %v52_v12, %v51_v11  ;;  %v195_v41 = vld [vmem:[%s616_s3 + $0x10] sm:$0xff]  ;;  %v193_v42 = vld [vmem:[%s616_s3] sm:$0xff]  ;;  %v196_v49 = vld [vmem:[%s616_s3 + $0x18] sm:$0xff] }
   0x7   :  { %379 = vmatprep.mubr.msk.bf16.mxu1 %vm28_vm0, %v55_v10  ;;  %374 = vmatpush3.bf16.msra.mxu0 %v389_v2  ;;  %v197_v46 = vld [vmem:[%s616_s3 + $0x20] sm:$0xff]  ;;  %v198_v61 = vld [vmem:[%s616_s3 + $0x28] sm:$0xff]  ;;  %v200_v7 = vld [vmem:[%s616_s3 + $0x38] sm:$0xff] }
   0x8   :  { %386 = vmatpush3.bf16.msra.mxu1 %v389_v2  ;;  %v39_v15 = vld [vmem:[#allocation2 + $0x10] sm:$0xff]  ;;  %v37_v17 = vld [vmem:[#allocation2] sm:$0xff]  ;;  %v194_v0 = vld [vmem:[%s616_s3 + $0x8] sm:$0xff] }
   0x9   :  { %v40_v21 = vld [vmem:[#allocation2 + $0x18] sm:$0xff]  ;;  %v38_v27 = vld [vmem:[#allocation2 + $0x8] sm:$0xff]  ;;  %v199_v9 = vld [vmem:[%s616_s3 + $0x30] sm:$0xff] }
   0xa   :  { %376 = vmatmul.mubr.msk.bf16.vlgmr.msra.gmra.mrb[0].mxu0 %vm28_vm0, %v54_v13  ;;  %v41_v18 = vld [vmem:[#allocation2 + $0x20] sm:$0xff]  ;;  %v42_v28 = vld [vmem:[#allocation2 + $0x28] sm:$0xff] }
   0xb   :  { %380 = vmatmul.mubr.msk.bf16.vlgmr.msra.gmra.mrb[0].mxu1 %vm28_vm0, %v56_v14  ;;  %v43_v16 = vld [vmem:[#allocation2 + $0x30] sm:$0xff]  ;;  %v44_v22 = vld [vmem:[#allocation2 + $0x38] sm:$0xff] }
  0xdd   :  { %v377_v19 = vpop.f32.mrb[0].mxu0 }
  0xde   :  { %v381_v20 = vpop.f32.mrb[0].mxu1  ;;  %v153_v23 = vadd.f32 %v377_v19, %v39_v15  ;;  %v120_v24 = vpop.f32.mrb[1].mxu0 }
  0xdf   :  { %v157_v25 = vadd.f32 %v381_v20, %v43_v16  ;;  %v136_v26 = vpop.f32.mrb[1].mxu1  ;;  %v151_v29 = vadd.f32 %v120_v24, %v37_v17  ;;  %v378_v30 = vpop.f32.mrb[2].mxu0 }
  0xe0   :  { %v155_v31 = vadd.f32 %v136_v26, %v41_v18  ;;  %v382_v32 = vpop.f32.mrb[2].mxu1  ;;  %161 = vst.msk [vmem:[#allocation2 + $0x10] sm:$0xff] %vm28_vm0, %v153_v23  ;;  %v154_v33 = vadd.f32 %v378_v30, %v40_v21  ;;  %v123_v34 = vpop.f32.mrb[3].mxu0 }
  0xe1   :  { %165 = vst.msk [vmem:[#allocation2 + $0x30] sm:$0xff] %vm28_vm0, %v157_v25  ;;  %v158_v35 = vadd.f32 %v382_v32, %v44_v22  ;;  %v139_v36 = vpop.f32.mrb[3].mxu1  ;;  %159 = vst.msk [vmem:[#allocation2] sm:$0xff] %vm28_vm0, %v151_v29  ;;  %v152_v37 = vadd.f32 %v123_v34, %v38_v27 }
  0xe2   :  { %163 = vst.msk [vmem:[#allocation2 + $0x20] sm:$0xff] %vm28_vm0, %v155_v31  ;;  %v156_v38 = vadd.f32 %v139_v36, %v42_v28  ;;  %162 = vst.msk [vmem:[#allocation2 + $0x18] sm:$0xff] %vm28_vm0, %v154_v33 }
  0xe3   :  { %166 = vst.msk [vmem:[#allocation2 + $0x38] sm:$0xff] %vm28_vm0, %v158_v35  ;;  %160 = vst.msk [vmem:[#allocation2 + $0x8] sm:$0xff] %vm28_vm0, %v152_v37 }
  0xe4   :  { %164 = vst.msk [vmem:[#allocation2 + $0x28] sm:$0xff] %vm28_vm0, %v156_v38 }
  0xe7   :  { %v172_v40 = vld [vmem:[#allocation2 + $0x10] sm:$0xff] }
  0xe8   :  { %v187_v43 = vadd.f32 %v362_v39, %v172_v40  ;;  %v170_v44 = vld [vmem:[#allocation2] sm:$0xff]  ;;  %v176_v1 = vld [vmem:[#allocation2 + $0x30] sm:$0xff] }
  0xe9   :  { %v174_v45 = vld [vmem:[#allocation2 + $0x20] sm:$0xff]  ;;  %v185_v47 = vadd.f32 %v362_v39, %v170_v44  ;;  %v173_v48 = vld [vmem:[#allocation2 + $0x18] sm:$0xff]  ;;  %v191_v8 = vadd.f32 %v362_v39, %v176_v1 }
  0xea   :  { %v189_v50 = vadd.f32 %v362_v39, %v174_v45  ;;  %v203_v51 = vadd.f32 %v195_v41, %v187_v43  ;;  %v188_v52 = vadd.f32 %v362_v39, %v173_v48  ;;  %v171_v54 = vld [vmem:[#allocation2 + $0x8] sm:$0xff]  ;;  %v177_v63 = vld [vmem:[#allocation2 + $0x38] sm:$0xff] }
  0xeb   :  { %v175_v53 = vld [vmem:[#allocation2 + $0x28] sm:$0xff]  ;;  %v201_v55 = vadd.f32 %v193_v42, %v185_v47  ;;  %v186_v62 = vadd.f32 %v362_v39, %v171_v54  ;;  %v192_v5 = vadd.f32 %v362_v39, %v177_v63  ;;  %v207_v13 = vadd.f32 %v199_v9, %v191_v8 }
  0xec   :  { %v205_v56 = vadd.f32 %v197_v46, %v189_v50  ;;  %v215_v57 = vsel %vm28_vm0, %v203_v51, 0.0  ;;  %v204_v58 = vadd.f32 %v196_v49, %v188_v52  ;;  %v190_v59 = vadd.f32 %v362_v39, %v175_v53 }
  0xed   :  { %216 = vadd.xlane.f32.xlu1 %v215_v57  ;;  %v209_v60 = vsel %vm28_vm0, %v201_v55, 0.0  ;;  %v202_v6 = vadd.f32 %v194_v0, %v186_v62  ;;  %v208_v11 = vadd.f32 %v200_v7, %v192_v5  ;;  %v227_v15 = vsel %vm28_vm0, %v207_v13, 0.0 }
  0xee   :  { %210 = vadd.xlane.f32.xlu0 %v209_v60  ;;  %v221_v2 = vsel %vm28_vm0, %v205_v56, 0.0  ;;  %v218_v3 = vsel %vm28_vm0, %v204_v58, 0.0  ;;  %v206_v4 = vadd.f32 %v198_v61, %v190_v59 }
  0xef   :  { %v212_v12 = vsel %vm28_vm0, %v202_v6, 0.0  ;;  %v230_v14 = vsel %vm28_vm0, %v208_v11, 0.0 }
  0xf0   :  { %v224_v10 = vsel %vm28_vm0, %v206_v4, 0.0 }
  0xf1   :  { %219 = vadd.xlane.f32.xlu1 %v218_v3 }
  0xf2   :  { %222 = vadd.xlane.f32.xlu0 %v221_v2 }
  0xf5   :  { %225 = vadd.xlane.f32.xlu1 %v224_v10 }
  0xf6   :  { %213 = vadd.xlane.f32.xlu0 %v212_v12  ;;  %v363_v12 = vld [vmem:[%s617_s4] ss:$0 sm:$0xff] }
  0xf9   :  { %231 = vadd.xlane.f32.xlu1 %v230_v14 }
  0xfa   :  { %228 = vadd.xlane.f32.xlu0 %v227_v15 }
 0x17a   :  { %v217_v16 = vpop.xlane.xlu1 %216 }
 0x17b   :  { %v236_v17 = vmul.f32 0.03125, %v217_v16  ;;  %v211_v18 = vpop.xlane.xlu0 %210  ;;  %v364_v16 = vld [vmem:[%s618_s5] ss:$0 sm:$0xff] }
 0x17c   :  { %v234_v19 = vmul.f32 0.03125, %v211_v18 }
 0x17d   :  { %v527_v20 = vsub.f32 %v203_v51, %v236_v17 }
 0x17e   :  { %v529_v21 = vsub.f32 %v201_v55, %v234_v19  ;;  %v220_v22 = vpop.xlane.xlu1 %219 }
 0x17f   :  { %v237_v23 = vmul.f32 0.03125, %v220_v22  ;;  %v223_v24 = vpop.xlane.xlu0 %222  ;;  %v252_v25 = vmul.f32 %v527_v20, %v527_v20 }
 0x180   :  { %v238_v26 = vmul.f32 0.03125, %v223_v24  ;;  %v250_v29 = vmul.f32 %v529_v21, %v529_v21 }
 0x181   :  { %v533_v27 = vsub.f32 %v204_v58, %v237_v23  ;;  %v264_v28 = vsel %vm28_vm0, %v252_v25, 0.0 }
 0x182   :  { %v538_v30 = vsub.f32 %v205_v56, %v238_v26  ;;  %v226_v31 = vpop.xlane.xlu1 %225  ;;  %265 = vadd.xlane.f32.xlu0 %v264_v28  ;;  %v258_v37 = vsel %vm28_vm0, %v250_v29, 0.0 }
 0x183   :  { %v239_v32 = vmul.f32 0.03125, %v226_v31  ;;  %v214_v33 = vpop.xlane.xlu0 %213  ;;  %v253_v34 = vmul.f32 %v533_v27, %v533_v27 }
 0x184   :  { %v235_v35 = vmul.f32 0.03125, %v214_v33  ;;  %v254_v38 = vmul.f32 %v538_v30, %v538_v30 }
 0x185   :  { %v267_v36 = vsel %vm28_vm0, %v253_v34, 0.0  ;;  %v546_v39 = vsub.f32 %v206_v4, %v239_v32 }
 0x186   :  { %v548_v40 = vsub.f32 %v202_v6, %v235_v35  ;;  %268 = vadd.xlane.f32.xlu1 %v267_v36  ;;  %v232_v41 = vpop.xlane.xlu1 %231  ;;  %259 = vadd.xlane.f32.xlu0 %v258_v37  ;;  %v270_v46 = vsel %vm28_vm0, %v254_v38, 0.0 }
 0x187   :  { %v241_v42 = vmul.f32 0.03125, %v232_v41  ;;  %v229_v43 = vpop.xlane.xlu0 %228  ;;  %v255_v50 = vmul.f32 %v546_v39, %v546_v39 }
 0x188   :  { %v240_v44 = vmul.f32 0.03125, %v229_v43  ;;  %v251_v45 = vmul.f32 %v548_v40, %v548_v40 }
 0x189   :  { %v553_v47 = vsub.f32 %v208_v11, %v241_v42  ;;  %v273_v52 = vsel %vm28_vm0, %v255_v50, 0.0 }
 0x18a   :  { %v555_v48 = vsub.f32 %v207_v13, %v240_v44  ;;  %271 = vadd.xlane.f32.xlu0 %v270_v46  ;;  %v261_v49 = vsel %vm28_vm0, %v251_v45, 0.0 }
 0x18b   :  { %262 = vadd.xlane.f32.xlu1 %v261_v49  ;;  %v257_v54 = vmul.f32 %v553_v47, %v553_v47 }
 0x18c   :  { %v256_v51 = vmul.f32 %v555_v48, %v555_v48 }
 0x18d   :  { %v279_v55 = vsel %vm28_vm0, %v257_v54, 0.0 }
 0x18e   :  { %v276_v53 = vsel %vm28_vm0, %v256_v51, 0.0 }
 0x18f   :  { %274 = vadd.xlane.f32.xlu1 %v273_v52  ;;  %277 = vadd.xlane.f32.xlu0 %v276_v53 }
 0x193   :  { %280 = vadd.xlane.f32.xlu1 %v279_v55 }
 0x20f   :  { %v266_v56 = vpop.xlane.xlu0 %265 }
 0x210   :  { %v284_v57 = vmul.f32 0.03125, %v266_v56 }
 0x212   :  { %v292_v58 = vadd.f32 1e-05, %v284_v57 }
 0x213   :  { %v269_v59 = vpop.xlane.xlu1 %268  ;;  %v260_v60 = vpop.xlane.xlu0 %259 }
 0x214   :  { %390 = vrsqrt.f32 %v292_v58  ;;  %v285_v61 = vmul.f32 0.03125, %v269_v59  ;;  %v282_v62 = vmul.f32 0.03125, %v260_v60 }
 0x216   :  { %v293_v63 = vadd.f32 1e-05, %v285_v61  ;;  %v290_v0 = vadd.f32 1e-05, %v282_v62 }
 0x217   :  { %v272_v1 = vpop.xlane.xlu0 %271 }
 0x218   :  { %392 = vrsqrt.f32 %v293_v63  ;;  %v286_v2 = vmul.f32 0.03125, %v272_v1  ;;  %v263_v3 = vpop.xlane.xlu1 %262 }
 0x219   :  { %394 = vrsqrt.f32 %v290_v0  ;;  %v283_v4 = vmul.f32 0.03125, %v263_v3 }
 0x21a   :  { %v294_v5 = vadd.f32 1e-05, %v286_v2 }
 0x21b   :  { %v291_v6 = vadd.f32 1e-05, %v283_v4 }
 0x21c   :  { %396 = vrsqrt.f32 %v294_v5  ;;  %v275_v7 = vpop.xlane.xlu1 %274  ;;  %v278_v8 = vpop.xlane.xlu0 %277 }
 0x21d   :  { %398 = vrsqrt.f32 %v291_v6  ;;  %v287_v9 = vmul.f32 0.03125, %v275_v7  ;;  %v288_v10 = vmul.f32 0.03125, %v278_v8 }
 0x21e   :  { %v391_v11 = vpop.eup %390 }
 0x21f   :  { %v308_v13 = vmul.f32 %v391_v11, %v527_v20  ;;  %v295_v14 = vadd.f32 1e-05, %v287_v9  ;;  %v296_v15 = vadd.f32 1e-05, %v288_v10 }
 0x220   :  { %v281_v17 = vpop.xlane.xlu1 %280 }
 0x221   :  { %v323_v18 = vmul.f32 %v363_v12, %v308_v13  ;;  %400 = vrsqrt.f32 %v295_v14  ;;  %v289_v19 = vmul.f32 0.03125, %v281_v17 }
 0x222   :  { %v393_v22 = vpop.eup %392  ;;  %402 = vrsqrt.f32 %v296_v15 }
 0x223   :  { %v395_v23 = vpop.eup %394  ;;  %v338_v24 = vadd.f32 %v364_v16, %v323_v18  ;;  %v309_v25 = vmul.f32 %v393_v22, %v533_v27  ;;  %v297_v26 = vadd.f32 1e-05, %v289_v19 }
 0x224   :  { %v306_v28 = vmul.f32 %v395_v23, %v529_v21 }
 0x225   :  { %346 = vst.msk [vmem:[%s619_s6 + $0x10] sm:$0xff] %vm28_vm0, %v338_v24  ;;  %v324_v20 = vmul.f32 %v363_v12, %v309_v25  ;;  %404 = vrsqrt.f32 %v297_v26 }
 0x226   :  { %v397_v29 = vpop.eup %396  ;;  %v321_v31 = vmul.f32 %v363_v12, %v306_v28 }
 0x227   :  { %v399_v32 = vpop.eup %398  ;;  %v339_v33 = vadd.f32 %v364_v16, %v324_v20  ;;  %v310_v34 = vmul.f32 %v397_v29, %v538_v30 }
 0x228   :  { %v336_v35 = vadd.f32 %v364_v16, %v321_v31  ;;  %v307_v36 = vmul.f32 %v399_v32, %v548_v40 }
 0x229   :  { %347 = vst.msk [vmem:[%s619_s6 + $0x18] sm:$0xff] %vm28_vm0, %v339_v33  ;;  %v325_v21 = vmul.f32 %v363_v12, %v310_v34 }
 0x22a   :  { %344 = vst.msk [vmem:[%s619_s6] sm:$0xff] %vm28_vm0, %v336_v35  ;;  %v322_v27 = vmul.f32 %v363_v12, %v307_v36 }
 0x22b   :  { %v401_v37 = vpop.eup %400  ;;  %v340_v38 = vadd.f32 %v364_v16, %v325_v21 }
 0x22c   :  { %v403_v41 = vpop.eup %402  ;;  %v337_v42 = vadd.f32 %v364_v16, %v322_v27  ;;  %v311_v30 = vmul.f32 %v401_v37, %v546_v39 }
 0x22d   :  { %348 = vst.msk [vmem:[%s619_s6 + $0x20] sm:$0xff] %vm28_vm0, %v340_v38  ;;  %v312_v40 = vmul.f32 %v403_v41, %v555_v48 }
 0x22e   :  { %345 = vst.msk [vmem:[%s619_s6 + $0x8] sm:$0xff] %vm28_vm0, %v337_v42  ;;  %v326_v43 = vmul.f32 %v363_v12, %v311_v30 }
 0x22f   :  { %v405_v44 = vpop.eup %404  ;;  %v327_v45 = vmul.f32 %v363_v12, %v312_v40 }
 0x230   :  { %v341_v46 = vadd.f32 %v364_v16, %v326_v43  ;;  %v313_v49 = vmul.f32 %v405_v44, %v553_v47 }
 0x231   :  { %v342_v50 = vadd.f32 %v364_v16, %v327_v45 }
 0x232   :  { %349 = vst.msk [vmem:[%s619_s6 + $0x28] sm:$0xff] %vm28_vm0, %v341_v46  ;;  %v328_v39 = vmul.f32 %v363_v12, %v313_v49 }
 0x233   :  { %350 = vst.msk [vmem:[%s619_s6 + $0x30] sm:$0xff] %vm28_vm0, %v342_v50 }
 0x234   :  { %v343_v48 = vadd.f32 %v364_v16, %v328_v39 }
 0x236   :  { %351 = vst.msk [vmem:[%s619_s6 + $0x38] sm:$0xff] %vm28_vm0, %v343_v48 }

// kernel: bert_forward.23
= control target key start
LH: loop header
LB: loop body
LE: loop exit
PB: predicated region body
PF: predicated region fallthrough
CT: control target
= control target key end

     0   :  { %vm20_vm0 = vcmask 130048   ;;  %vm65_vm1 = vcmask 261120   ;;  %v269_v9 = vmov 0.0   ;;  %s366_s0 = inlined_call_operand.vmem [shape: f32[64,32], index: 0, kind: input, shape index: {}]   ;;  %s367_s1 = inlined_call_operand.vmem [shape: bf16[32,16], index: 1, kind: input, shape index: {}]   ;;  %s368_s2 = inlined_call_operand.vmem [shape: f32[1,16], index: 2, kind: input, shape index: {}]   ;;  %s369_s3 = inlined_call_operand.hbm [shape: f32[64,16], index: 3, kind: output, shape index: {}]  }
   0x1   :  { %v243_v0 = vld [vmem:[%s367_s1] sm:$0xff]   ;;  %v244_v1 = vld [vmem:[%s367_s1 + $0x8] sm:$0xff]   ;;  %v39_v7 = vld [vmem:[%s366_s0 + $0x10] sm:$0xff]  ;;  %23 = vst.msk [vmem:[#allocation2 + $0x10] sm:$0xff] %vm20_vm0, %v269_v9 }
   0x2   :  { %223 = vmatprep.subr.bf16.mxu0 %v243_v0  ;;  %235 = vmatprep.subr.bf16.mxu1 %v243_v0  ;;  %v37_v2 = vld [vmem:[%s366_s0] sm:$0xff]  ;;  %v38_v3 = vld [vmem:[%s366_s0 + $0x8] sm:$0xff]  ;;  %v40_v8 = vld [vmem:[%s366_s0 + $0x18] sm:$0xff]  ;;  %21 = vst.msk [vmem:[#allocation2] sm:$0xff] %vm20_vm0, %v269_v9 }
   0x3   :  { %v41_v4 = vld [vmem:[%s366_s0 + $0x20] sm:$0xff]  ;;  %224 = vmatpush3.bf16.msra.mxu0 %v243_v0  ;;  %237 = vmatpush3.bf16.msra.mxu1 %v243_v0  ;;  %v45_v5 = vpack.c.bf16 %v38_v3, %v37_v2  ;;  %v42_v6 = vld [vmem:[%s366_s0 + $0x28] sm:$0xff]  ;;  %22 = vst.msk [vmem:[#allocation2 + $0x8] sm:$0xff] %vm20_vm0, %v269_v9  ;;  %24 = vst.msk [vmem:[#allocation2 + $0x18] sm:$0xff] %vm20_vm0, %v269_v9 }
   0x4   :  { %25 = vst.msk [vmem:[#allocation2 + $0x20] sm:$0xff] %vm20_vm0, %v269_v9  ;;  %26 = vst.msk [vmem:[#allocation2 + $0x28] sm:$0xff] %vm20_vm0, %v269_v9  ;;  %225 = vmatprep.subr.bf16.mxu0 %v244_v1  ;;  %236 = vmatprep.subr.bf16.mxu1 %v244_v1  ;;  %v47_v10 = vpack.c.bf16 %v42_v6, %v41_v4  ;;  %v43_v11 = vld [vmem:[%s366_s0 + $0x30] sm:$0xff]  ;;  %v44_v12 = vld [vmem:[%s366_s0 + $0x38] sm:$0xff] }
   0x5   :  { %27 = vst.msk [vmem:[#allocation2 + $0x30] sm:$0xff] %vm20_vm0, %v269_v9  ;;  %28 = vst.msk [vmem:[#allocation2 + $0x38] sm:$0xff] %vm20_vm0, %v269_v9 }
   0x6   :  { %8 = vsyncpa [#allocation4], 0  ;;  %227 = vmatprep.mubr.msk.bf16.mxu0 %vm65_vm1, %v45_v5  ;;  %231 = vmatprep.mubr.msk.bf16.mxu1 %vm65_vm1, %v47_v10  ;;  %v46_v13 = vpack.c.bf16 %v40_v8, %v39_v7  ;;  %v48_v14 = vpack.c.bf16 %v44_v12, %v43_v11  ;;  %v216_v39 = vld [vmem:[%s368_s2] ss:$0 sm:$0xff]  ;;  %s270_s5 = smov [#allocation3]  }
   0x7   :  { %226 = vmatpush3.bf16.msra.mxu0 %v244_v1  ;;  %238 = vmatpush3.bf16.msra.mxu1 %v244_v1  ;;  %s199_s6 = sshll.u32 %s270_s5, 4  ;;  %s200_s6 = int_to_ptr.vmem [resolvable:$true] %s199_s6 }
   0x8   :  { %v31_v15 = vld [vmem:[#allocation2 + $0x10] sm:$0xff]  ;;  %s245_s2 = scalar_lea.vmem %s200_s6, 1024  ;;  %p250_p1 = scmp.lt.s32.totalorder %s200_s6, %s200_s6 }
   0x9   :  { %v29_v17 = vld [vmem:[#allocation2] sm:$0xff]  ;;  %p246_p0 = scmp.ne.s32.totalorder %s200_s6, %s245_s2  ;;  %p251_p2 = scmp.lt.s32.totalorder %s245_s2, %s245_s2 }
   0xa   :  { %228 = vmatmul.mubr.msk.bf16.vlgmr.msra.gmra.mrb[0].mxu0 %vm65_vm1, %v46_v13  ;;  %232 = vmatmul.mubr.msk.bf16.vlgmr.msra.gmra.mrb[0].mxu1 %vm65_vm1, %v48_v14  ;;  %v32_v21 = vld [vmem:[#allocation2 + $0x18] sm:$0xff]  ;;  %v30_v27 = vld [vmem:[#allocation2 + $0x8] sm:$0xff] }
   0xb   :  { %v33_v18 = vld [vmem:[#allocation2 + $0x20] sm:$0xff]  ;;  %v34_v28 = vld [vmem:[#allocation2 + $0x28] sm:$0xff]  ;;  %p252_p3 = por %p251_p2, %p250_p1 }
   0xc   :  { %v35_v16 = vld [vmem:[#allocation2 + $0x30] sm:$0xff]  ;;  %v36_v22 = vld [vmem:[#allocation2 + $0x38] sm:$0xff] }
   0xd   :  { %p253_p4 = pnand %p252_p3, %p246_p0 }
  0xdd   :  { %v229_v19 = vpop.f32.mrb[0].mxu0  ;;  %v233_v20 = vpop.f32.mrb[0].mxu1 }
  0xde   :  { %v145_v23 = vadd.f32 %v229_v19, %v31_v15  ;;  %v149_v24 = vadd.f32 %v233_v20, %v35_v16  ;;  %v112_v25 = vpop.f32.mrb[1].mxu0  ;;  %v128_v26 = vpop.f32.mrb[1].mxu1 }
  0xdf   :  { %v143_v29 = vadd.f32 %v112_v25, %v29_v17  ;;  %v147_v30 = vadd.f32 %v128_v26, %v33_v18  ;;  %v230_v31 = vpop.f32.mrb[2].mxu0  ;;  %v234_v32 = vpop.f32.mrb[2].mxu1 }
  0xe0   :  { %154 = vst.msk [vmem:[#allocation2 + $0x10] sm:$0xff] %vm20_vm0, %v145_v23  ;;  %158 = vst.msk [vmem:[#allocation2 + $0x30] sm:$0xff] %vm20_vm0, %v149_v24  ;;  %v146_v33 = vadd.f32 %v230_v31, %v32_v21  ;;  %v150_v34 = vadd.f32 %v234_v32, %v36_v22  ;;  %v115_v35 = vpop.f32.mrb[3].mxu0  ;;  %v131_v36 = vpop.f32.mrb[3].mxu1 }
  0xe1   :  { %152 = vst.msk [vmem:[#allocation2] sm:$0xff] %vm20_vm0, %v143_v29  ;;  %156 = vst.msk [vmem:[#allocation2 + $0x20] sm:$0xff] %vm20_vm0, %v147_v30  ;;  %v144_v37 = vadd.f32 %v115_v35, %v30_v27  ;;  %v148_v38 = vadd.f32 %v131_v36, %v34_v28 }
  0xe2   :  { %155 = vst.msk [vmem:[#allocation2 + $0x18] sm:$0xff] %vm20_vm0, %v146_v33  ;;  %159 = vst.msk [vmem:[#allocation2 + $0x38] sm:$0xff] %vm20_vm0, %v150_v34 }
  0xe3   :  { %153 = vst.msk [vmem:[#allocation2 + $0x8] sm:$0xff] %vm20_vm0, %v144_v37  ;;  %157 = vst.msk [vmem:[#allocation2 + $0x28] sm:$0xff] %vm20_vm0, %v148_v38 }
  0xe7   :  { %v165_v40 = vld [vmem:[#allocation2 + $0x10] sm:$0xff] }
  0xe8   :  { %v169_v41 = vld [vmem:[#allocation2 + $0x30] sm:$0xff]  ;;  %v163_v42 = vld [vmem:[#allocation2] sm:$0xff]  ;;  %v180_v44 = vadd.f32 %v216_v39, %v165_v40 }
  0xe9   :  { %v167_v43 = vld [vmem:[#allocation2 + $0x20] sm:$0xff]  ;;  %v184_v45 = vadd.f32 %v216_v39, %v169_v41  ;;  %v166_v46 = vld [vmem:[#allocation2 + $0x18] sm:$0xff]  ;;  %v178_v48 = vadd.f32 %v216_v39, %v163_v42 }
  0xea   :  { %v170_v47 = vld [vmem:[#allocation2 + $0x38] sm:$0xff]  ;;  %v182_v49 = vadd.f32 %v216_v39, %v167_v43  ;;  %v164_v50 = vld [vmem:[#allocation2 + $0x8] sm:$0xff]  ;;  %v181_v52 = vadd.f32 %v216_v39, %v166_v46  ;;  %188 = vst.msk [vmem:[#allocation3 + $0x10] sm:$0xff] %vm20_vm0, %v180_v44 }
  0xeb   :  { %v168_v51 = vld [vmem:[#allocation2 + $0x28] sm:$0xff]  ;;  %v185_v53 = vadd.f32 %v216_v39, %v170_v47  ;;  %192 = vst.msk [vmem:[#allocation3 + $0x30] sm:$0xff] %vm20_vm0, %v184_v45  ;;  %v179_v54 = vadd.f32 %v216_v39, %v164_v50  ;;  %186 = vst.msk [vmem:[#allocation3] sm:$0xff] %vm20_vm0, %v178_v48 }
  0xec   :  { %v183_v55 = vadd.f32 %v216_v39, %v168_v51  ;;  %190 = vst.msk [vmem:[#allocation3 + $0x20] sm:$0xff] %vm20_vm0, %v182_v49  ;;  %189 = vst.msk [vmem:[#allocation3 + $0x18] sm:$0xff] %vm20_vm0, %v181_v52 }
  0xed   :  { %193 = vst.msk [vmem:[#allocation3 + $0x38] sm:$0xff] %vm20_vm0, %v185_v53  ;;  %187 = vst.msk [vmem:[#allocation3 + $0x8] sm:$0xff] %vm20_vm0, %v179_v54 }
  0xee   :  { %191 = vst.msk [vmem:[#allocation3 + $0x28] sm:$0xff] %vm20_vm0, %v183_v55 }
  0xef   :  { %256 = shalt.err (!%p253_p4)
}
  0xf0   :  { %s257_s9 = scalar_lea.hbm %s369_s3, 1024 }
  0xf1   :  { %p258_p5 = scmp.ne.s32.totalorder %s369_s3, %s257_s9  ;;  %p261_p6 = scmp.lt.u32.totalorder %s257_s9, %s369_s3 }
  0xf3   :  { %p263_p7 = pnand %p261_p6, %p258_p5 }
  0xf5   :  { %266 = shalt.err (!%p263_p7)
}
  0xf6   :  { %s271_s14 = smov 128   ;;  %s272_s15 = smov 8  }
  0xf7   :  { %205 = dma.vmem_to_hbm [thread:$0]  %s200_s6, 1024, %s369_s3, [#allocation4], %s271_s14, %s271_s14, %s272_s15  }
  0xf8   :  { %267 = dma.done.wait [#allocation4], 1024  }
  0xf9   :  { %268 = vsyncadd [#allocation4], 4294966272 }
  0xfa   :  { %209 = vsyncpa [#allocation4], 1 }

// kernel: bert_forward.16
= control target key start
LH: loop header
LB: loop body
LE: loop exit
PB: predicated region body
PF: predicated region fallthrough
CT: control target
= control target key end

     0   :  { %vm19_vm0 = vcmask 523264   ;;  %v237_v1 = vmov 0.0   ;;  %vm64_vm1 = vcmask 261120   ;;  %s343_s1 = inlined_call_operand.vmem [shape: bf16[32,64], index: 1, kind: input, shape index: {}]   ;;  %s344_s0 = inlined_call_operand.vmem [shape: f32[64,32], index: 0, kind: input, shape index: {}]   ;;  %s345_s2 = inlined_call_operand.vmem [shape: f32[1,64], index: 2, kind: input, shape index: {}]   ;;  %s346_s3 = inlined_call_operand.vmem [shape: f32[64,64], index: 3, kind: output, shape index: {}]  }
   0x1   :  { %v235_v0 = vld [vmem:[%s343_s1] sm:$0xff]   ;;  %22 = vst.msk [vmem:[#allocation2 + $0x10] sm:$0xff] %vm19_vm0, %v237_v1  ;;  %20 = vst.msk [vmem:[#allocation2] sm:$0xff] %vm19_vm0, %v237_v1  ;;  %v236_v2 = vld [vmem:[%s343_s1 + $0x8] sm:$0xff]  }
   0x2   :  { %21 = vst.msk [vmem:[#allocation2 + $0x8] sm:$0xff] %vm19_vm0, %v237_v1  ;;  %23 = vst.msk [vmem:[#allocation2 + $0x18] sm:$0xff] %vm19_vm0, %v237_v1  ;;  %218 = vmatprep.subr.bf16.mxu0 %v235_v0  ;;  %230 = vmatprep.subr.bf16.mxu1 %v235_v0  ;;  %v36_v3 = vld [vmem:[%s344_s0] sm:$0xff]  ;;  %v37_v4 = vld [vmem:[%s344_s0 + $0x8] sm:$0xff] }
   0x3   :  { %24 = vst.msk [vmem:[#allocation2 + $0x20] sm:$0xff] %vm19_vm0, %v237_v1  ;;  %25 = vst.msk [vmem:[#allocation2 + $0x28] sm:$0xff] %vm19_vm0, %v237_v1  ;;  %v40_v5 = vld [vmem:[%s344_s0 + $0x20] sm:$0xff]  ;;  %219 = vmatpush3.bf16.msra.mxu0 %v235_v0  ;;  %232 = vmatpush3.bf16.msra.mxu1 %v235_v0  ;;  %v44_v6 = vpack.c.bf16 %v37_v4, %v36_v3  ;;  %v41_v7 = vld [vmem:[%s344_s0 + $0x28] sm:$0xff] }
   0x4   :  { %26 = vst.msk [vmem:[#allocation2 + $0x30] sm:$0xff] %vm19_vm0, %v237_v1  ;;  %27 = vst.msk [vmem:[#allocation2 + $0x38] sm:$0xff] %vm19_vm0, %v237_v1  ;;  %v38_v8 = vld [vmem:[%s344_s0 + $0x10] sm:$0xff]  ;;  %v39_v9 = vld [vmem:[%s344_s0 + $0x18] sm:$0xff]  ;;  %220 = vmatprep.subr.bf16.mxu0 %v236_v2  ;;  %231 = vmatprep.subr.bf16.mxu1 %v236_v2  ;;  %v46_v10 = vpack.c.bf16 %v41_v7, %v40_v5 }
   0x5   :  { %v42_v11 = vld [vmem:[%s344_s0 + $0x30] sm:$0xff]  ;;  %v43_v12 = vld [vmem:[%s344_s0 + $0x38] sm:$0xff]  ;;  %222 = vmatprep.mubr.msk.bf16.mxu0 %vm64_vm1, %v44_v6  ;;  %v45_v13 = vpack.c.bf16 %v39_v9, %v38_v8  ;;  %v211_v39 = vld [vmem:[%s345_s2] ss:$0 sm:$0xff] }
   0x6   :  { %226 = vmatprep.mubr.msk.bf16.mxu1 %vm64_vm1, %v46_v10  ;;  %v47_v14 = vpack.c.bf16 %v43_v12, %v42_v11 }
   0x7   :  { %221 = vmatpush3.bf16.msra.mxu0 %v236_v2  ;;  %233 = vmatpush3.bf16.msra.mxu1 %v236_v2 }
   0x8   :  { %v30_v15 = vld [vmem:[#allocation2 + $0x10] sm:$0xff]  ;;  %v28_v17 = vld [vmem:[#allocation2] sm:$0xff] }
   0x9   :  { %v31_v21 = vld [vmem:[#allocation2 + $0x18] sm:$0xff]  ;;  %v29_v27 = vld [vmem:[#allocation2 + $0x8] sm:$0xff] }
   0xa   :  { %223 = vmatmul.mubr.msk.bf16.vlgmr.msra.gmra.mrb[0].mxu0 %vm64_vm1, %v45_v13  ;;  %227 = vmatmul.mubr.msk.bf16.vlgmr.msra.gmra.mrb[0].mxu1 %vm64_vm1, %v47_v14  ;;  %v32_v18 = vld [vmem:[#allocation2 + $0x20] sm:$0xff]  ;;  %v33_v28 = vld [vmem:[#allocation2 + $0x28] sm:$0xff] }
   0xb   :  { %v34_v16 = vld [vmem:[#allocation2 + $0x30] sm:$0xff]  ;;  %v35_v22 = vld [vmem:[#allocation2 + $0x38] sm:$0xff] }
  0xdd   :  { %v224_v19 = vpop.f32.mrb[0].mxu0  ;;  %v228_v20 = vpop.f32.mrb[0].mxu1 }
  0xde   :  { %v144_v23 = vadd.f32 %v224_v19, %v30_v15  ;;  %v148_v24 = vadd.f32 %v228_v20, %v34_v16  ;;  %v111_v25 = vpop.f32.mrb[1].mxu0  ;;  %v127_v26 = vpop.f32.mrb[1].mxu1 }
  0xdf   :  { %v142_v29 = vadd.f32 %v111_v25, %v28_v17  ;;  %v146_v30 = vadd.f32 %v127_v26, %v32_v18  ;;  %v225_v31 = vpop.f32.mrb[2].mxu0  ;;  %v229_v32 = vpop.f32.mrb[2].mxu1 }
  0xe0   :  { %153 = vst.msk [vmem:[#allocation2 + $0x10] sm:$0xff] %vm19_vm0, %v144_v23  ;;  %157 = vst.msk [vmem:[#allocation2 + $0x30] sm:$0xff] %vm19_vm0, %v148_v24  ;;  %v145_v33 = vadd.f32 %v225_v31, %v31_v21  ;;  %v149_v34 = vadd.f32 %v229_v32, %v35_v22  ;;  %v114_v35 = vpop.f32.mrb[3].mxu0  ;;  %v130_v36 = vpop.f32.mrb[3].mxu1 }
  0xe1   :  { %151 = vst.msk [vmem:[#allocation2] sm:$0xff] %vm19_vm0, %v142_v29  ;;  %155 = vst.msk [vmem:[#allocation2 + $0x20] sm:$0xff] %vm19_vm0, %v146_v30  ;;  %v143_v37 = vadd.f32 %v114_v35, %v29_v27  ;;  %v147_v38 = vadd.f32 %v130_v36, %v33_v28 }
  0xe2   :  { %154 = vst.msk [vmem:[#allocation2 + $0x18] sm:$0xff] %vm19_vm0, %v145_v33  ;;  %158 = vst.msk [vmem:[#allocation2 + $0x38] sm:$0xff] %vm19_vm0, %v149_v34 }
  0xe3   :  { %152 = vst.msk [vmem:[#allocation2 + $0x8] sm:$0xff] %vm19_vm0, %v143_v37  ;;  %156 = vst.msk [vmem:[#allocation2 + $0x28] sm:$0xff] %vm19_vm0, %v147_v38 }
  0xe7   :  { %v164_v40 = vld [vmem:[#allocation2 + $0x10] sm:$0xff] }
  0xe8   :  { %v168_v41 = vld [vmem:[#allocation2 + $0x30] sm:$0xff]  ;;  %v179_v42 = vadd.f32 %v211_v39, %v164_v40  ;;  %v162_v44 = vld [vmem:[#allocation2] sm:$0xff] }
  0xe9   :  { %v183_v43 = vadd.f32 %v211_v39, %v168_v41  ;;  %v166_v45 = vld [vmem:[#allocation2 + $0x20] sm:$0xff]  ;;  %v177_v46 = vadd.f32 %v211_v39, %v162_v44  ;;  %v165_v48 = vld [vmem:[#allocation2 + $0x18] sm:$0xff] }
  0xea   :  { %v181_v47 = vadd.f32 %v211_v39, %v166_v45  ;;  %v169_v49 = vld [vmem:[#allocation2 + $0x38] sm:$0xff]  ;;  %v187_v50 = vmax.f32 %v179_v42, 0.0  ;;  %v180_v52 = vadd.f32 %v211_v39, %v165_v48  ;;  %v163_v54 = vld [vmem:[#allocation2 + $0x8] sm:$0xff] }
  0xeb   :  { %v191_v51 = vmax.f32 %v183_v43, 0.0  ;;  %v184_v53 = vadd.f32 %v211_v39, %v169_v49  ;;  %v167_v55 = vld [vmem:[#allocation2 + $0x28] sm:$0xff]  ;;  %v185_v56 = vmax.f32 %v177_v46, 0.0  ;;  %v178_v58 = vadd.f32 %v211_v39, %v163_v54 }
  0xec   :  { %v189_v57 = vmax.f32 %v181_v47, 0.0  ;;  %v182_v59 = vadd.f32 %v211_v39, %v167_v55  ;;  %195 = vst.msk [vmem:[%s346_s3 + $0x10] sm:$0xff] %vm19_vm0, %v187_v50  ;;  %v188_v60 = vmax.f32 %v180_v52, 0.0 }
  0xed   :  { %199 = vst.msk [vmem:[%s346_s3 + $0x30] sm:$0xff] %vm19_vm0, %v191_v51  ;;  %v192_v61 = vmax.f32 %v184_v53, 0.0  ;;  %193 = vst.msk [vmem:[%s346_s3] sm:$0xff] %vm19_vm0, %v185_v56  ;;  %v186_v62 = vmax.f32 %v178_v58, 0.0 }
  0xee   :  { %197 = vst.msk [vmem:[%s346_s3 + $0x20] sm:$0xff] %vm19_vm0, %v189_v57  ;;  %v190_v63 = vmax.f32 %v182_v59, 0.0  ;;  %196 = vst.msk [vmem:[%s346_s3 + $0x18] sm:$0xff] %vm19_vm0, %v188_v60 }
  0xef   :  { %200 = vst.msk [vmem:[%s346_s3 + $0x38] sm:$0xff] %vm19_vm0, %v192_v61  ;;  %194 = vst.msk [vmem:[%s346_s3 + $0x8] sm:$0xff] %vm19_vm0, %v186_v62 }
  0xf0   :  { %198 = vst.msk [vmem:[%s346_s3 + $0x28] sm:$0xff] %vm19_vm0, %v190_v63 }

// kernel: bert_forward.17
= control target key start
LH: loop header
LB: loop body
LE: loop exit
PB: predicated region body
PF: predicated region fallthrough
CT: control target
= control target key end

     0   :  { %vm28_vm0 = vcmask 261120   ;;  %v437_v1 = vmov 0.0   ;;  %vm89_vm1 = vcmask 523264   ;;  %s650_s1 = inlined_call_operand.vmem [shape: bf16[64,32], index: 1, kind: input, shape index: {}]   ;;  %s651_s0 = inlined_call_operand.vmem [shape: f32[64,64], index: 0, kind: input, shape index: {}]   ;;  %s652_s2 = inlined_call_operand.vmem [shape: f32[1,32], index: 2, kind: input, shape index: {}]   ;;  %s653_s3 = inlined_call_operand.vmem [shape: f32[64,32], index: 3, kind: input, shape index: {}]   ;;  %s654_s4 = inlined_call_operand.vmem [shape: f32[1,32], index: 4, kind: input, shape index: {}]   ;;  %s655_s5 = inlined_call_operand.vmem [shape: f32[1,32], index: 5, kind: input, shape index: {}]   ;;  %s656_s6 = inlined_call_operand.vmem [shape: f32[64,32], index: 6, kind: output, shape index: {}]  }
   0x1   :  { %v417_v0 = vld [vmem:[%s650_s1] sm:$0xff]   ;;  %31 = vst.msk [vmem:[#allocation2 + $0x10] sm:$0xff] %vm28_vm0, %v437_v1  ;;  %29 = vst.msk [vmem:[#allocation2] sm:$0xff] %vm28_vm0, %v437_v1  ;;  %v418_v2 = vld [vmem:[%s650_s1 + $0x8] sm:$0xff]  }
   0x2   :  { %30 = vst.msk [vmem:[#allocation2 + $0x8] sm:$0xff] %vm28_vm0, %v437_v1  ;;  %32 = vst.msk [vmem:[#allocation2 + $0x18] sm:$0xff] %vm28_vm0, %v437_v1  ;;  %392 = vmatprep.subr.bf16.mxu0 %v417_v0  ;;  %408 = vmatprep.subr.bf16.mxu1 %v417_v0  ;;  %v419_v3 = vld [vmem:[%s650_s1 + $0x10] sm:$0xff]   ;;  %v45_v4 = vld [vmem:[%s651_s0] sm:$0xff] }
   0x3   :  { %33 = vst.msk [vmem:[#allocation2 + $0x20] sm:$0xff] %vm28_vm0, %v437_v1  ;;  %34 = vst.msk [vmem:[#allocation2 + $0x28] sm:$0xff] %vm28_vm0, %v437_v1  ;;  %393 = vmatpush3.bf16.msra.mxu0 %v417_v0  ;;  %412 = vmatpush3.bf16.msra.mxu1 %v417_v0  ;;  %v46_v5 = vld [vmem:[%s651_s0 + $0x8] sm:$0xff]  ;;  %v49_v7 = vld [vmem:[%s651_s0 + $0x20] sm:$0xff] }
   0x4   :  { %35 = vst.msk [vmem:[#allocation2 + $0x30] sm:$0xff] %vm28_vm0, %v437_v1  ;;  %36 = vst.msk [vmem:[#allocation2 + $0x38] sm:$0xff] %vm28_vm0, %v437_v1  ;;  %394 = vmatprep.subr.bf16.mxu0 %v418_v2  ;;  %409 = vmatprep.subr.bf16.mxu1 %v418_v2  ;;  %v53_v6 = vpack.c.bf16 %v46_v5, %v45_v4  ;;  %v50_v8 = vld [vmem:[%s651_s0 + $0x28] sm:$0xff]  ;;  %v420_v10 = vld [vmem:[%s650_s1 + $0x18] sm:$0xff]  }
   0x5   :  { %v55_v9 = vpack.c.bf16 %v50_v8, %v49_v7  ;;  %v47_v11 = vld [vmem:[%s651_s0 + $0x10] sm:$0xff]  ;;  %v48_v12 = vld [vmem:[%s651_s0 + $0x18] sm:$0xff]  ;;  %v381_v41 = vld [vmem:[%s652_s2] ss:$0 sm:$0xff] }
   0x6   :  { %400 = vmatprep.mubr.msk.bf16.mxu0 %vm89_vm1, %v53_v6  ;;  %v51_v13 = vld [vmem:[%s651_s0 + $0x30] sm:$0xff]  ;;  %v52_v14 = vld [vmem:[%s651_s0 + $0x38] sm:$0xff]  ;;  %v54_v15 = vpack.c.bf16 %v48_v12, %v47_v11  ;;  %v210_v44 = vld [vmem:[%s653_s3] sm:$0xff] }
   0x7   :  { %395 = vmatpush3.bf16.msra.mxu0 %v418_v2  ;;  %413 = vmatpush3.bf16.msra.mxu1 %v418_v2  ;;  %v56_v16 = vpack.c.bf16 %v52_v14, %v51_v13  ;;  %v212_v43 = vld [vmem:[%s653_s3 + $0x10] sm:$0xff]  ;;  %v214_v48 = vld [vmem:[%s653_s3 + $0x20] sm:$0xff]  ;;  %v213_v51 = vld [vmem:[%s653_s3 + $0x18] sm:$0xff] }
   0x8   :  { %396 = vmatprep.subr.bf16.mxu0 %v419_v3  ;;  %410 = vmatprep.subr.bf16.mxu1 %v419_v3  ;;  %v39_v17 = vld [vmem:[#allocation2 + $0x10] sm:$0xff]  ;;  %v37_v19 = vld [vmem:[#allocation2] sm:$0xff]  ;;  %v215_v63 = vld [vmem:[%s653_s3 + $0x28] sm:$0xff] }
   0x9   :  { %404 = vmatprep.mubr.msk.bf16.mxu1 %vm89_vm1, %v55_v9  ;;  %v40_v23 = vld [vmem:[#allocation2 + $0x18] sm:$0xff]  ;;  %v38_v29 = vld [vmem:[#allocation2 + $0x8] sm:$0xff]  ;;  %v216_v11 = vld [vmem:[%s653_s3 + $0x30] sm:$0xff] }
   0xa   :  { %v41_v20 = vld [vmem:[#allocation2 + $0x20] sm:$0xff]  ;;  %v42_v30 = vld [vmem:[#allocation2 + $0x28] sm:$0xff]  ;;  %v217_v9 = vld [vmem:[%s653_s3 + $0x38] sm:$0xff] }
   0xb   :  { %397 = vmatpush3.bf16.msra.mxu0 %v419_v3  ;;  %414 = vmatpush3.bf16.msra.mxu1 %v419_v3  ;;  %v43_v18 = vld [vmem:[#allocation2 + $0x30] sm:$0xff]  ;;  %v44_v24 = vld [vmem:[#allocation2 + $0x38] sm:$0xff]  ;;  %v211_v2 = vld [vmem:[%s653_s3 + $0x8] sm:$0xff] }
   0xc   :  { %398 = vmatprep.subr.bf16.mxu0 %v420_v10  ;;  %411 = vmatprep.subr.bf16.mxu1 %v420_v10 }
   0xf   :  { %399 = vmatpush3.bf16.msra.mxu0 %v420_v10  ;;  %415 = vmatpush3.bf16.msra.mxu1 %v420_v10 }
  0x12   :  { %401 = vmatmul.mubr.msk.bf16.vlgmr.msra.gmra.mrb[0].mxu0 %vm89_vm1, %v54_v15  ;;  %405 = vmatmul.mubr.msk.bf16.vlgmr.msra.gmra.mrb[0].mxu1 %vm89_vm1, %v56_v16 }
  0xe5   :  { %v402_v21 = vpop.f32.mrb[0].mxu0  ;;  %v406_v22 = vpop.f32.mrb[0].mxu1 }
  0xe6   :  { %v169_v25 = vadd.f32 %v402_v21, %v39_v17  ;;  %v136_v26 = vpop.f32.mrb[1].mxu0  ;;  %v173_v27 = vadd.f32 %v406_v22, %v43_v18  ;;  %v152_v28 = vpop.f32.mrb[1].mxu1 }
  0xe7   :  { %v167_v31 = vadd.f32 %v136_v26, %v37_v19  ;;  %v403_v32 = vpop.f32.mrb[2].mxu0  ;;  %v171_v33 = vadd.f32 %v152_v28, %v41_v20  ;;  %v407_v34 = vpop.f32.mrb[2].mxu1 }
  0xe8   :  { %178 = vst.msk [vmem:[#allocation2 + $0x10] sm:$0xff] %vm28_vm0, %v169_v25  ;;  %182 = vst.msk [vmem:[#allocation2 + $0x30] sm:$0xff] %vm28_vm0, %v173_v27  ;;  %v170_v35 = vadd.f32 %v403_v32, %v40_v23  ;;  %v139_v36 = vpop.f32.mrb[3].mxu0  ;;  %v174_v37 = vadd.f32 %v407_v34, %v44_v24  ;;  %v155_v38 = vpop.f32.mrb[3].mxu1 }
  0xe9   :  { %176 = vst.msk [vmem:[#allocation2] sm:$0xff] %vm28_vm0, %v167_v31  ;;  %180 = vst.msk [vmem:[#allocation2 + $0x20] sm:$0xff] %vm28_vm0, %v171_v33  ;;  %v168_v39 = vadd.f32 %v139_v36, %v38_v29  ;;  %v172_v40 = vadd.f32 %v155_v38, %v42_v30 }
  0xea   :  { %179 = vst.msk [vmem:[#allocation2 + $0x18] sm:$0xff] %vm28_vm0, %v170_v35  ;;  %183 = vst.msk [vmem:[#allocation2 + $0x38] sm:$0xff] %vm28_vm0, %v174_v37 }
  0xeb   :  { %177 = vst.msk [vmem:[#allocation2 + $0x8] sm:$0xff] %vm28_vm0, %v168_v39  ;;  %181 = vst.msk [vmem:[#allocation2 + $0x28] sm:$0xff] %vm28_vm0, %v172_v40 }
  0xef   :  { %v189_v42 = vld [vmem:[#allocation2 + $0x10] sm:$0xff] }
  0xf0   :  { %v204_v45 = vadd.f32 %v381_v41, %v189_v42  ;;  %v187_v46 = vld [vmem:[#allocation2] sm:$0xff]  ;;  %v193_v3 = vld [vmem:[#allocation2 + $0x30] sm:$0xff] }
  0xf1   :  { %v191_v47 = vld [vmem:[#allocation2 + $0x20] sm:$0xff]  ;;  %v202_v49 = vadd.f32 %v381_v41, %v187_v46  ;;  %v190_v50 = vld [vmem:[#allocation2 + $0x18] sm:$0xff]  ;;  %v208_v10 = vadd.f32 %v381_v41, %v193_v3 }
  0xf2   :  { %v206_v52 = vadd.f32 %v381_v41, %v191_v47  ;;  %v220_v53 = vadd.f32 %v212_v43, %v204_v45  ;;  %v205_v54 = vadd.f32 %v381_v41, %v190_v50  ;;  %v192_v55 = vld [vmem:[#allocation2 + $0x28] sm:$0xff]  ;;  %v194_v1 = vld [vmem:[#allocation2 + $0x38] sm:$0xff] }
  0xf3   :  { %v188_v56 = vld [vmem:[#allocation2 + $0x8] sm:$0xff]  ;;  %v218_v57 = vadd.f32 %v210_v44, %v202_v49  ;;  %v207_v61 = vadd.f32 %v381_v41, %v192_v55  ;;  %v209_v7 = vadd.f32 %v381_v41, %v194_v1  ;;  %v224_v15 = vadd.f32 %v216_v11, %v208_v10 }
  0xf4   :  { %v222_v58 = vadd.f32 %v214_v48, %v206_v52  ;;  %v232_v59 = vsel %vm28_vm0, %v220_v53, 0.0  ;;  %v221_v60 = vadd.f32 %v213_v51, %v205_v54  ;;  %v203_v0 = vadd.f32 %v381_v41, %v188_v56 }
  0xf5   :  { %233 = vadd.xlane.f32.xlu1 %v232_v59  ;;  %v226_v62 = vsel %vm28_vm0, %v218_v57, 0.0  ;;  %v223_v6 = vadd.f32 %v215_v63, %v207_v61  ;;  %v225_v13 = vadd.f32 %v217_v9, %v209_v7  ;;  %v244_v17 = vsel %vm28_vm0, %v224_v15, 0.0 }
  0xf6   :  { %227 = vadd.xlane.f32.xlu0 %v226_v62  ;;  %v238_v4 = vsel %vm28_vm0, %v222_v58, 0.0  ;;  %v235_v5 = vsel %vm28_vm0, %v221_v60, 0.0  ;;  %v219_v8 = vadd.f32 %v211_v2, %v203_v0 }
  0xf7   :  { %v241_v12 = vsel %vm28_vm0, %v223_v6, 0.0  ;;  %v247_v16 = vsel %vm28_vm0, %v225_v13, 0.0 }
  0xf8   :  { %v229_v14 = vsel %vm28_vm0, %v219_v8, 0.0 }
  0xf9   :  { %236 = vadd.xlane.f32.xlu1 %v235_v5 }
  0xfa   :  { %239 = vadd.xlane.f32.xlu0 %v238_v4 }
  0xfd   :  { %242 = vadd.xlane.f32.xlu1 %v241_v12 }
  0xfe   :  { %230 = vadd.xlane.f32.xlu0 %v229_v14  ;;  %v382_v14 = vld [vmem:[%s654_s4] ss:$0 sm:$0xff] }
 0x101   :  { %248 = vadd.xlane.f32.xlu1 %v247_v16 }
 0x102   :  { %245 = vadd.xlane.f32.xlu0 %v244_v17 }
 0x182   :  { %v234_v18 = vpop.xlane.xlu1 %233 }
 0x183   :  { %v253_v19 = vmul.f32 0.03125, %v234_v18  ;;  %v228_v20 = vpop.xlane.xlu0 %227  ;;  %v383_v18 = vld [vmem:[%s655_s5] ss:$0 sm:$0xff] }
 0x184   :  { %v251_v21 = vmul.f32 0.03125, %v228_v20 }
 0x185   :  { %v564_v22 = vsub.f32 %v220_v53, %v253_v19 }
 0x186   :  { %v566_v23 = vsub.f32 %v218_v57, %v251_v21  ;;  %v237_v24 = vpop.xlane.xlu1 %236 }
 0x187   :  { %v254_v25 = vmul.f32 0.03125, %v237_v24  ;;  %v240_v26 = vpop.xlane.xlu0 %239  ;;  %v269_v27 = vmul.f32 %v564_v22, %v564_v22 }
 0x188   :  { %v255_v28 = vmul.f32 0.03125, %v240_v26  ;;  %v267_v31 = vmul.f32 %v566_v23, %v566_v23 }
 0x189   :  { %v570_v29 = vsub.f32 %v221_v60, %v254_v25  ;;  %v281_v30 = vsel %vm28_vm0, %v269_v27, 0.0 }
 0x18a   :  { %v575_v32 = vsub.f32 %v222_v58, %v255_v28  ;;  %v243_v33 = vpop.xlane.xlu1 %242  ;;  %282 = vadd.xlane.f32.xlu0 %v281_v30  ;;  %v275_v39 = vsel %vm28_vm0, %v267_v31, 0.0 }
 0x18b   :  { %v256_v34 = vmul.f32 0.03125, %v243_v33  ;;  %v231_v35 = vpop.xlane.xlu0 %230  ;;  %v270_v36 = vmul.f32 %v570_v29, %v570_v29 }
 0x18c   :  { %v252_v37 = vmul.f32 0.03125, %v231_v35  ;;  %v271_v40 = vmul.f32 %v575_v32, %v575_v32 }
 0x18d   :  { %v284_v38 = vsel %vm28_vm0, %v270_v36, 0.0  ;;  %v583_v41 = vsub.f32 %v223_v6, %v256_v34 }
 0x18e   :  { %v585_v42 = vsub.f32 %v219_v8, %v252_v37  ;;  %285 = vadd.xlane.f32.xlu1 %v284_v38  ;;  %v249_v43 = vpop.xlane.xlu1 %248  ;;  %276 = vadd.xlane.f32.xlu0 %v275_v39  ;;  %v287_v48 = vsel %vm28_vm0, %v271_v40, 0.0 }
 0x18f   :  { %v258_v44 = vmul.f32 0.03125, %v249_v43  ;;  %v246_v45 = vpop.xlane.xlu0 %245  ;;  %v272_v52 = vmul.f32 %v583_v41, %v583_v41 }
 0x190   :  { %v257_v46 = vmul.f32 0.03125, %v246_v45  ;;  %v268_v47 = vmul.f32 %v585_v42, %v585_v42 }
 0x191   :  { %v590_v49 = vsub.f32 %v225_v13, %v258_v44  ;;  %v290_v54 = vsel %vm28_vm0, %v272_v52, 0.0 }
 0x192   :  { %v592_v50 = vsub.f32 %v224_v15, %v257_v46  ;;  %288 = vadd.xlane.f32.xlu0 %v287_v48  ;;  %v278_v51 = vsel %vm28_vm0, %v268_v47, 0.0 }
 0x193   :  { %279 = vadd.xlane.f32.xlu1 %v278_v51  ;;  %v274_v56 = vmul.f32 %v590_v49, %v590_v49 }
 0x194   :  { %v273_v53 = vmul.f32 %v592_v50, %v592_v50 }
 0x195   :  { %v296_v57 = vsel %vm28_vm0, %v274_v56, 0.0 }
 0x196   :  { %v293_v55 = vsel %vm28_vm0, %v273_v53, 0.0 }
 0x197   :  { %291 = vadd.xlane.f32.xlu1 %v290_v54  ;;  %294 = vadd.xlane.f32.xlu0 %v293_v55 }
 0x19b   :  { %297 = vadd.xlane.f32.xlu1 %v296_v57 }
 0x217   :  { %v283_v58 = vpop.xlane.xlu0 %282 }
 0x218   :  { %v301_v59 = vmul.f32 0.03125, %v283_v58 }
 0x21a   :  { %v309_v60 = vadd.f32 1e-05, %v301_v59 }
 0x21b   :  { %v286_v61 = vpop.xlane.xlu1 %285  ;;  %v277_v62 = vpop.xlane.xlu0 %276 }
 0x21c   :  { %421 = vrsqrt.f32 %v309_v60  ;;  %v302_v63 = vmul.f32 0.03125, %v286_v61  ;;  %v299_v0 = vmul.f32 0.03125, %v277_v62 }
 0x21e   :  { %v310_v1 = vadd.f32 1e-05, %v302_v63  ;;  %v307_v2 = vadd.f32 1e-05, %v299_v0 }
 0x21f   :  { %v289_v3 = vpop.xlane.xlu0 %288 }
 0x220   :  { %423 = vrsqrt.f32 %v310_v1  ;;  %v303_v4 = vmul.f32 0.03125, %v289_v3  ;;  %v280_v5 = vpop.xlane.xlu1 %279 }
 0x221   :  { %425 = vrsqrt.f32 %v307_v2  ;;  %v300_v6 = vmul.f32 0.03125, %v280_v5 }
 0x222   :  { %v311_v7 = vadd.f32 1e-05, %v303_v4 }
 0x223   :  { %v308_v8 = vadd.f32 1e-05, %v300_v6 }
 0x224   :  { %427 = vrsqrt.f32 %v311_v7  ;;  %v292_v9 = vpop.xlane.xlu1 %291  ;;  %v295_v10 = vpop.xlane.xlu0 %294 }
 0x225   :  { %429 = vrsqrt.f32 %v308_v8  ;;  %v304_v11 = vmul.f32 0.03125, %v292_v9  ;;  %v305_v12 = vmul.f32 0.03125, %v295_v10 }
 0x226   :  { %v422_v13 = vpop.eup %421 }
 0x227   :  { %v325_v15 = vmul.f32 %v422_v13, %v564_v22  ;;  %v312_v16 = vadd.f32 1e-05, %v304_v11  ;;  %v313_v17 = vadd.f32 1e-05, %v305_v12 }
 0x228   :  { %v298_v19 = vpop.xlane.xlu1 %297 }
 0x229   :  { %v340_v20 = vmul.f32 %v382_v14, %v325_v15  ;;  %431 = vrsqrt.f32 %v312_v16  ;;  %v306_v21 = vmul.f32 0.03125, %v298_v19 }
 0x22a   :  { %v424_v24 = vpop.eup %423  ;;  %433 = vrsqrt.f32 %v313_v17 }
 0x22b   :  { %v426_v25 = vpop.eup %425  ;;  %v355_v26 = vadd.f32 %v383_v18, %v340_v20  ;;  %v326_v27 = vmul.f32 %v424_v24, %v570_v29  ;;  %v314_v28 = vadd.f32 1e-05, %v306_v21 }
 0x22c   :  { %v323_v30 = vmul.f32 %v426_v25, %v566_v23 }
 0x22d   :  { %363 = vst.msk [vmem:[%s656_s6 + $0x10] sm:$0xff] %vm28_vm0, %v355_v26  ;;  %v341_v22 = vmul.f32 %v382_v14, %v326_v27  ;;  %435 = vrsqrt.f32 %v314_v28 }
 0x22e   :  { %v428_v31 = vpop.eup %427  ;;  %v338_v33 = vmul.f32 %v382_v14, %v323_v30 }
 0x22f   :  { %v430_v34 = vpop.eup %429  ;;  %v356_v35 = vadd.f32 %v383_v18, %v341_v22  ;;  %v327_v36 = vmul.f32 %v428_v31, %v575_v32 }
 0x230   :  { %v353_v37 = vadd.f32 %v383_v18, %v338_v33  ;;  %v324_v38 = vmul.f32 %v430_v34, %v585_v42 }
 0x231   :  { %364 = vst.msk [vmem:[%s656_s6 + $0x18] sm:$0xff] %vm28_vm0, %v356_v35  ;;  %v342_v23 = vmul.f32 %v382_v14, %v327_v36 }
 0x232   :  { %361 = vst.msk [vmem:[%s656_s6] sm:$0xff] %vm28_vm0, %v353_v37  ;;  %v339_v29 = vmul.f32 %v382_v14, %v324_v38 }
 0x233   :  { %v432_v39 = vpop.eup %431  ;;  %v357_v40 = vadd.f32 %v383_v18, %v342_v23 }
 0x234   :  { %v434_v43 = vpop.eup %433  ;;  %v354_v44 = vadd.f32 %v383_v18, %v339_v29  ;;  %v328_v32 = vmul.f32 %v432_v39, %v583_v41 }
 0x235   :  { %365 = vst.msk [vmem:[%s656_s6 + $0x20] sm:$0xff] %vm28_vm0, %v357_v40  ;;  %v329_v42 = vmul.f32 %v434_v43, %v592_v50 }
 0x236   :  { %362 = vst.msk [vmem:[%s656_s6 + $0x8] sm:$0xff] %vm28_vm0, %v354_v44  ;;  %v343_v45 = vmul.f32 %v382_v14, %v328_v32 }
 0x237   :  { %v436_v46 = vpop.eup %435  ;;  %v344_v47 = vmul.f32 %v382_v14, %v329_v42 }
 0x238   :  { %v358_v48 = vadd.f32 %v383_v18, %v343_v45  ;;  %v330_v51 = vmul.f32 %v436_v46, %v590_v49 }
 0x239   :  { %v359_v52 = vadd.f32 %v383_v18, %v344_v47 }
 0x23a   :  { %366 = vst.msk [vmem:[%s656_s6 + $0x28] sm:$0xff] %vm28_vm0, %v358_v48  ;;  %v345_v41 = vmul.f32 %v382_v14, %v330_v51 }
 0x23b   :  { %367 = vst.msk [vmem:[%s656_s6 + $0x30] sm:$0xff] %vm28_vm0, %v359_v52 }
 0x23c   :  { %v360_v50 = vadd.f32 %v383_v18, %v345_v41 }
 0x23e   :  { %368 = vst.msk [vmem:[%s656_s6 + $0x38] sm:$0xff] %vm28_vm0, %v360_v50 }

</bundles_post_ra>
